<compile_context>
chip_gen: v7x
topology: tpu7x:2x2x1
jax: 0.10.0
libtpu: 0.0.40
codegen_flags: <defaults>
</compile_context>

<pallas_src>
import jax
import jax.numpy as jnp
from jax.experimental import pallas as pl
from jax.experimental.pallas import tpu as pltpu


OUT_DIM = 10    # Linear(512, 10)
OUT_PAD = 128   # lane-dense padded output width (sliced back in the wrapper)


def mlp_kernel(x_ref, w1_ref, b1_ref, w2_ref, b2_ref, w3_ref, b3_ref, o_ref):
    # x_ref: (TILE_B, 784) f32 -> bf16 in-kernel; weights bf16; biases f32.
    x = x_ref[...].astype(jnp.bfloat16)

    h1 = jnp.dot(x, w1_ref[...], preferred_element_type=jnp.float32)
    h1 = jnp.maximum(h1 + b1_ref[...], 0.0).astype(jnp.bfloat16)

    h2 = jnp.dot(h1, w2_ref[...], preferred_element_type=jnp.float32)
    h2 = jnp.maximum(h2 + b2_ref[...], 0.0).astype(jnp.bfloat16)

    h3 = jnp.dot(h2, w3_ref[...], preferred_element_type=jnp.float32)
    h3 = jnp.maximum(h3 + b3_ref[...], 0.0)   # module spec has final ReLU

    o_ref[...] = h3.astype(o_ref.dtype)       # bf16, lane-dense (TILE_B, 128)


def _round_up(n, m):
    return ((n + m - 1) // m) * m


def _choose_tile_b(batch):
    if batch < 16:
        # Single tile == full padded batch (block equals full array dim).
        return max(8, _round_up(batch, 8))
    # >= 2 grid steps (v7x megacore sharding), <= 512 rows/step, multiple of 16.
    return min(512, _round_up((batch + 1) // 2, 16))


def prepare_params(params):
    """One-time weight prep: bf16 cast + 128-lane pad of the last layer."""
    w1, b1, w2, b2, w3, b3 = params
    H = w1.shape[1]
    w1p = w1.astype(jnp.bfloat16)                                # (784, 512)
    w2p = w2.astype(jnp.bfloat16)                                # (512, 512)
    w3p = jnp.zeros((H, OUT_PAD), jnp.bfloat16).at[:, :OUT_DIM].set(
        w3.astype(jnp.bfloat16))                                 # (512, 128)
    b1p = b1.reshape(1, -1).astype(jnp.float32)
    b2p = b2.reshape(1, -1).astype(jnp.float32)
    b3p = jnp.zeros((1, OUT_PAD), jnp.float32).at[:, :OUT_DIM].set(
        b3.reshape(1, -1).astype(jnp.float32))
    return (w1p, b1p, w2p, b2p, w3p, b3p)


@jax.jit
def neural_network_forward(x_nchw, prepared_params):
    """x_nchw: (B, 1, 28, 28). Returns logits (B, 10) float32."""
    w1p, b1p, w2p, b2p, w3p, b3p = prepared_params
    B = x_nchw.shape[0]
    K, H = w1p.shape                      # 784, 512

    x_flat = x_nchw.reshape(B, K).astype(jnp.float32)    # nn.Flatten()

    TILE_B = _choose_tile_b(B)
    B_PAD = _round_up(B, TILE_B)
    if B_PAD != B:
        x_flat = jnp.pad(x_flat, ((0, B_PAD - B), (0, 0)))
    grid = (B_PAD // TILE_B,)

    flops = 2 * B_PAD * (K * H + H * H + H * OUT_PAD)
    bytes_accessed = (
        4 * B_PAD * K                                  # f32 activations in
        + 2 * (w1p.size + w2p.size + w3p.size)         # bf16 weights (resident)
        + 4 * (b1p.size + b2p.size + b3p.size)         # f32 biases
        + 2 * B_PAD * OUT_PAD                          # bf16 output
    )

    out_padded = pl.pallas_call(
        mlp_kernel,
        out_shape=jax.ShapeDtypeStruct((B_PAD, OUT_PAD), jnp.bfloat16),
        grid=grid,
        in_specs=[
            # x tile pipelined over the batch axis; 784 == full last dim.
            pl.BlockSpec((TILE_B, K), lambda i: (i, 0)),
            # Weights/biases: constant index_map -> DMA'd once, VMEM-resident.
            pl.BlockSpec((K, H), lambda i: (0, 0)),
            pl.BlockSpec((1, H), lambda i: (0, 0)),
            pl.BlockSpec((H, H), lambda i: (0, 0)),
            pl.BlockSpec((1, H), lambda i: (0, 0)),
            pl.BlockSpec((H, OUT_PAD), lambda i: (0, 0)),
            pl.BlockSpec((1, OUT_PAD), lambda i: (0, 0)),
        ],
        out_specs=pl.BlockSpec((TILE_B, OUT_PAD), lambda i: (i, 0)),
        compiler_params=pltpu.CompilerParams(
            dimension_semantics=("parallel",),     # megacore sharding on v7x
            vmem_limit_bytes=32 * 1024 * 1024,
        ),
        cost_estimate=pl.CostEstimate(
            flops=flops, transcendentals=0, bytes_accessed=bytes_accessed),
    )(x_flat, w1p, b1p, w2p, b2p, w3p, b3p)

    return out_padded[:B, :OUT_DIM].astype(jnp.float32)


def init_params(key):
    """Deterministic init matching nn.Linear shapes (stored transposed)."""
    ks = jax.random.split(key, 6)

    def linear_init(kw, kb, fan_in, fan_out):
        bound = 1.0 / jnp.sqrt(fan_in)
        w = jax.random.uniform(kw, (fan_in, fan_out), jnp.float32, -bound, bound)
        b = jax.random.uniform(kb, (1, fan_out), jnp.float32, -bound, bound)
        return w, b

    w1, b1 = linear_init(ks[0], ks[1], 28 * 28, 512)
    w2, b2 = linear_init(ks[2], ks[3], 512, 512)
    w3, b3 = linear_init(ks[4], ks[5], 512, 10)
    return (w1, b1, w2, b2, w3, b3)


def reference_forward(x_nchw, params):
    """Pure-JAX reference mirroring the kernel's bf16-storage / f32-accum path."""
    w1, b1, w2, b2, w3, b3 = params
    bf = lambda a: a.astype(jnp.bfloat16)
    xf = bf(x_nchw.reshape(x_nchw.shape[0], -1))
    h = jnp.maximum(
        jnp.dot(xf, bf(w1), preferred_element_type=jnp.float32) + b1, 0.0)
    h = jnp.maximum(
        jnp.dot(bf(h), bf(w2), preferred_element_type=jnp.float32) + b2, 0.0)
    h = jnp.maximum(
        jnp.dot(bf(h), bf(w3), preferred_element_type=jnp.float32) + b3, 0.0)
    return h.astype(jnp.bfloat16).astype(jnp.float32)


if __name__ == "__main__":
    key = jax.random.PRNGKey(0)
    kp, kx1, kx2 = jax.random.split(key, 3)
    params = init_params(kp)
    prepared = prepare_params(params)   # one-time bf16 cast / pad

    # Small batch: single tile, grid=(1,).
    x_small = jax.random.normal(kx1, (8, 1, 28, 28), jnp.float32)
    logits_small = jax.block_until_ready(neural_network_forward(x_small, prepared))
    assert logits_small.shape == (8, 10)
    ref_small = reference_forward(x_small, params)
    assert jnp.allclose(logits_small, ref_small, atol=3e-2, rtol=3e-2)

    # Batch exercising >=2 grid steps + batch padding (TILE_B=32, grid=2).
    x_big = jax.random.normal(kx2, (40, 1, 28, 28), jnp.float32)
    logits_big = jax.block_until_ready(neural_network_forward(x_big, prepared))
    assert logits_big.shape == (40, 10)
    ref_big = reference_forward(x_big, params)
    assert jnp.allclose(logits_big, ref_big, atol=3e-2, rtol=3e-2)

    print("KERNEL_OK")
</pallas_src>

<mosaic_0001>
module attributes {stable_mosaic.version = 11 : i64} {
  func.func @mlp_kernel(%arg0: i32, %arg1: memref<8x784xf32, #tpu.memory_space<vmem>>, %arg2: memref<784x512xbf16, #tpu.memory_space<vmem>>, %arg3: memref<1x512xf32, #tpu.memory_space<vmem>>, %arg4: memref<512x512xbf16, #tpu.memory_space<vmem>>, %arg5: memref<1x512xf32, #tpu.memory_space<vmem>>, %arg6: memref<512x128xbf16, #tpu.memory_space<vmem>>, %arg7: memref<1x128xf32, #tpu.memory_space<vmem>>, %arg8: memref<8x128xbf16, #tpu.memory_space<vmem>>) attributes {dimension_semantics = [#tpu.dimension_semantics<parallel>], iteration_bounds = array<i64: 1>, scalar_prefetch = 0 : i64, scratch_operands = 0 : i64, tpu.core_type = #tpu.core_type<tc>, window_params = [{transform_indices = @transform_0, window_bounds = array<i64: 8, 784>}, {pipeline_mode = #tpu.pipeline_mode<synchronous>, transform_indices = @transform_1, window_bounds = array<i64: 784, 512>}, {pipeline_mode = #tpu.pipeline_mode<synchronous>, transform_indices = @transform_2, window_bounds = array<i64: 1, 512>}, {pipeline_mode = #tpu.pipeline_mode<synchronous>, transform_indices = @transform_3, window_bounds = array<i64: 512, 512>}, {pipeline_mode = #tpu.pipeline_mode<synchronous>, transform_indices = @transform_4, window_bounds = array<i64: 1, 512>}, {pipeline_mode = #tpu.pipeline_mode<synchronous>, transform_indices = @transform_5, window_bounds = array<i64: 512, 128>}, {pipeline_mode = #tpu.pipeline_mode<synchronous>, transform_indices = @transform_6, window_bounds = array<i64: 1, 128>}, {transform_indices = @transform_7, window_bounds = array<i64: 8, 128>}]} {
    %c0 = arith.constant 0 : index
    %c0_0 = arith.constant 0 : index
    %0 = vector.load %arg1[%c0, %c0_0] : memref<8x784xf32, #tpu.memory_space<vmem>>, vector<8x784xf32>
    %1 = arith.truncf %0 : vector<8x784xf32> to vector<8x784xbf16>
    %c0_1 = arith.constant 0 : index
    %c0_2 = arith.constant 0 : index
    %2 = vector.load %arg2[%c0_1, %c0_2] : memref<784x512xbf16, #tpu.memory_space<vmem>>, vector<784x512xbf16>
    %cst = arith.constant dense<0.000000e+00> : vector<8x512xf32>
    %3 = tpu.matmul %1, %2, %cst {dimension_numbers = #tpu.dot_dimension_numbers<[1], [0], [0], [1], [0, 0, 1, 1], [], []>} : vector<8x784xbf16>, vector<784x512xbf16>, vector<8x512xf32> -> vector<8x512xf32>
    %c0_3 = arith.constant 0 : index
    %c0_4 = arith.constant 0 : index
    %4 = vector.load %arg3[%c0_3, %c0_4] : memref<1x512xf32, #tpu.memory_space<vmem>>, vector<1x512xf32>
    %5 = vector.broadcast %4 : vector<1x512xf32> to vector<8x512xf32>
    %6 = arith.addf %3, %5 : vector<8x512xf32>
    %cst_5 = arith.constant 0.000000e+00 : f32
    %7 = vector.broadcast %cst_5 : f32 to vector<8x512xf32>
    %8 = arith.maximumf %6, %7 : vector<8x512xf32>
    %9 = arith.truncf %8 : vector<8x512xf32> to vector<8x512xbf16>
    %c0_6 = arith.constant 0 : index
    %c0_7 = arith.constant 0 : index
    %10 = vector.load %arg4[%c0_6, %c0_7] : memref<512x512xbf16, #tpu.memory_space<vmem>>, vector<512x512xbf16>
    %cst_8 = arith.constant dense<0.000000e+00> : vector<8x512xf32>
    %11 = tpu.matmul %9, %10, %cst_8 {dimension_numbers = #tpu.dot_dimension_numbers<[1], [0], [0], [1], [0, 0, 1, 1], [], []>} : vector<8x512xbf16>, vector<512x512xbf16>, vector<8x512xf32> -> vector<8x512xf32>
    %c0_9 = arith.constant 0 : index
    %c0_10 = arith.constant 0 : index
    %12 = vector.load %arg5[%c0_9, %c0_10] : memref<1x512xf32, #tpu.memory_space<vmem>>, vector<1x512xf32>
    %13 = vector.broadcast %12 : vector<1x512xf32> to vector<8x512xf32>
    %14 = arith.addf %11, %13 : vector<8x512xf32>
    %cst_11 = arith.constant 0.000000e+00 : f32
    %15 = vector.broadcast %cst_11 : f32 to vector<8x512xf32>
    %16 = arith.maximumf %14, %15 : vector<8x512xf32>
    %17 = arith.truncf %16 : vector<8x512xf32> to vector<8x512xbf16>
    %c0_12 = arith.constant 0 : index
    %c0_13 = arith.constant 0 : index
    %18 = vector.load %arg6[%c0_12, %c0_13] : memref<512x128xbf16, #tpu.memory_space<vmem>>, vector<512x128xbf16>
    %cst_14 = arith.constant dense<0.000000e+00> : vector<8x128xf32>
    %19 = tpu.matmul %17, %18, %cst_14 {dimension_numbers = #tpu.dot_dimension_numbers<[1], [0], [0], [1], [0, 0, 1, 1], [], []>} : vector<8x512xbf16>, vector<512x128xbf16>, vector<8x128xf32> -> vector<8x128xf32>
    %c0_15 = arith.constant 0 : index
    %c0_16 = arith.constant 0 : index
    %20 = vector.load %arg7[%c0_15, %c0_16] : memref<1x128xf32, #tpu.memory_space<vmem>>, vector<1x128xf32>
    %21 = vector.broadcast %20 : vector<1x128xf32> to vector<8x128xf32>
    %22 = arith.addf %19, %21 : vector<8x128xf32>
    %cst_17 = arith.constant 0.000000e+00 : f32
    %23 = vector.broadcast %cst_17 : f32 to vector<8x128xf32>
    %24 = arith.maximumf %22, %23 : vector<8x128xf32>
    %25 = arith.truncf %24 : vector<8x128xf32> to vector<8x128xbf16>
    %c0_18 = arith.constant 0 : index
    %c0_19 = arith.constant 0 : index
    %26 = vector.load %arg8[%c0_18, %c0_19] : memref<8x128xbf16, #tpu.memory_space<vmem>>, vector<8x128xbf16>
    tpu.vector_store %arg8[%c0_18, %c0_19], %25 {strides = array<i32>} : memref<8x128xbf16, #tpu.memory_space<vmem>>, vector<8x128xbf16>,
    return
  }
  func.func @transform_0(%arg0: i32) -> (i32, i32) {
    %c0_i32 = arith.constant 0 : i32
    %c0_i32_0 = arith.constant 0 : i32
    return %arg0, %c0_i32 : i32, i32
  }
  func.func @transform_1(%arg0: i32) -> (i32, i32) {
    %c0_i32 = arith.constant 0 : i32
    %c0_i32_0 = arith.constant 0 : i32
    %c0_i32_1 = arith.constant 0 : i32
    return %c0_i32, %c0_i32_0 : i32, i32
  }
  func.func @transform_2(%arg0: i32) -> (i32, i32) {
    %c0_i32 = arith.constant 0 : i32
    %c0_i32_0 = arith.constant 0 : i32
    %c0_i32_1 = arith.constant 0 : i32
    return %c0_i32, %c0_i32_0 : i32, i32
  }
  func.func @transform_3(%arg0: i32) -> (i32, i32) {
    %c0_i32 = arith.constant 0 : i32
    %c0_i32_0 = arith.constant 0 : i32
    %c0_i32_1 = arith.constant 0 : i32
    return %c0_i32, %c0_i32_0 : i32, i32
  }
  func.func @transform_4(%arg0: i32) -> (i32, i32) {
    %c0_i32 = arith.constant 0 : i32
    %c0_i32_0 = arith.constant 0 : i32
    %c0_i32_1 = arith.constant 0 : i32
    return %c0_i32, %c0_i32_0 : i32, i32
  }
  func.func @transform_5(%arg0: i32) -> (i32, i32) {
    %c0_i32 = arith.constant 0 : i32
    %c0_i32_0 = arith.constant 0 : i32
    %c0_i32_1 = arith.constant 0 : i32
    return %c0_i32, %c0_i32_0 : i32, i32
  }
  func.func @transform_6(%arg0: i32) -> (i32, i32) {
    %c0_i32 = arith.constant 0 : i32
    %c0_i32_0 = arith.constant 0 : i32
    %c0_i32_1 = arith.constant 0 : i32
    return %c0_i32, %c0_i32_0 : i32, i32
  }
  func.func @transform_7(%arg0: i32) -> (i32, i32) {
    %c0_i32 = arith.constant 0 : i32
    %c0_i32_0 = arith.constant 0 : i32
    return %arg0, %c0_i32 : i32, i32
  }
}

</mosaic_0001>

<bundles_post_ra>
// kernel: neural_network_forward.1
= control target key start
LH: loop header
LB: loop body
LE: loop exit
PB: predicated region body
PF: predicated region fallthrough
CT: control target
= control target key end

     0   :  { %12 = vsyncpa [#allocation3], 0  ;;  %s4164_s0 = inlined_call_operand.vmem [shape: f32[8,784], index: 0, kind: input, shape index: {}]   ;;  %s4165_s1 = inlined_call_operand.hbm [shape: bf16[784,512], index: 1, kind: input, shape index: {}]   ;;  %s4166_s2 = inlined_call_operand.vmem [shape: f32[1,512], index: 2, kind: input, shape index: {}]   ;;  %s4167_s3 = inlined_call_operand.hbm [shape: bf16[512,512], index: 3, kind: input, shape index: {}]   ;;  %s4168_s4 = inlined_call_operand.vmem [shape: f32[1,512], index: 4, kind: input, shape index: {}]   ;;  %s4169_s5 = inlined_call_operand.vmem [shape: bf16[512,128], index: 5, kind: input, shape index: {}]   ;;  %s4170_s6 = inlined_call_operand.vmem [shape: f32[1,128], index: 6, kind: input, shape index: {}]   ;;  %s4171_s7 = inlined_call_operand.vmem [shape: bf16[8,128], index: 7, kind: output, shape index: {}]  }
   0x1   :  { %13 = vsyncpa [#allocation5], 0  ;;  %s3935_s24 = smov [#allocation2]   ;;  %s3887_s28 = scalar_lea.hbm %s4165_s1, 25088 }
   0x2   :  { %s21_s25 = sshll.u32 %s3935_s24, 4  ;;  %p3888_p0 = scmp.ne.s32.totalorder %s4165_s1, %s3887_s28  ;;  %s22_s25 = int_to_ptr.vmem [resolvable:$true] %s21_s25 }
   0x3   :  { %p3891_p1 = scmp.lt.u32.totalorder %s3887_s28, %s4165_s1 }
   0x5   :  { %p3893_p2 = pnand %p3891_p1, %p3888_p0 }
   0x7   :  { %3896 = shalt.err (!%p3893_p2)
}
   0x8   :  { %s3897_s10 = scalar_lea.vmem %s22_s25, 25088  ;;  %p3902_p4 = scmp.lt.s32.totalorder %s22_s25, %s22_s25 }
   0x9   :  { %p3898_p3 = scmp.ne.s32.totalorder %s22_s25, %s3897_s10  ;;  %p3903_p5 = scmp.lt.s32.totalorder %s3897_s10, %s3897_s10 }
   0xb   :  { %p3904_p6 = por %p3903_p5, %p3902_p4 }
   0xd   :  { %p3905_p7 = pnand %p3904_p6, %p3898_p3 }
   0xf   :  { %3908 = shalt.err (!%p3905_p7)
}
  0x10   :  { %s3936_s11 = smov 256   ;;  %s3937_s12 = smov 16  }
  0x11   :  { %27 = dma.hbm_to_vmem [thread:$0]  %s4165_s1, 25088, %s22_s25, [#allocation3], %s3936_s11, %s3936_s11, %s3937_s12  }
  0x12   :  { %s3938_s15 = smov [#allocation4]   ;;  %s3909_s19 = scalar_lea.hbm %s4167_s3, 16384 }
  0x13   :  { %s35_s16 = sshll.u32 %s3938_s15, 4  ;;  %p3910_p8 = scmp.ne.s32.totalorder %s4167_s3, %s3909_s19  ;;  %s36_s16 = int_to_ptr.vmem [resolvable:$true] %s35_s16 }
  0x14   :  { %p3913_p9 = scmp.lt.u32.totalorder %s3909_s19, %s4167_s3 }
  0x16   :  { %p3915_p10 = pnand %p3913_p9, %p3910_p8 }
  0x18   :  { %3918 = shalt.err (!%p3915_p10)
}
  0x19   :  { %s3919_s24 = scalar_lea.vmem %s36_s16, 16384  ;;  %p3924_p12 = scmp.lt.s32.totalorder %s36_s16, %s36_s16 }
  0x1a   :  { %p3920_p11 = scmp.ne.s32.totalorder %s36_s16, %s3919_s24  ;;  %p3925_p13 = scmp.lt.s32.totalorder %s3919_s24, %s3919_s24 }
  0x1c   :  { %p3926_p0 = por %p3925_p13, %p3924_p12 }
  0x1e   :  { %p3927_p1 = pnand %p3926_p0, %p3920_p11 }
  0x20   :  { %3930 = shalt.err (!%p3927_p1)
}
  0x21   :  { %41 = dma.hbm_to_vmem [thread:$0]  %s4167_s3, 16384, %s36_s16, [#allocation5], %s3936_s11, %s3936_s11, %s3937_s12  }
  0x22   :  { %3931 = dma.done.wait [#allocation3], 25088  }
  0x23   :  { %3932 = vsyncadd [#allocation3], 4294942208 }
  0x24   :  { %3933 = dma.done.wait [#allocation5], 16384  }
  0x25   :  { %3934 = vsyncadd [#allocation5], 4294950912  ;;  %v3369_v0 = vld [vmem:[#allocation2 + $0x4] ss:$16 sps:$4 sm:$0xff]   ;;  %v3371_v1 = vld [vmem:[#allocation2 + $0xc] ss:$16 sps:$4 sm:$0xff]  }
  0x26   :  { %1271 = vmatprep.subr.bf16.mxu0 %v3369_v0  ;;  %v3373_v2 = vld [vmem:[#allocation2] ss:$16 sps:$4 sm:$0xff]   ;;  %v3374_v3 = vld [vmem:[#allocation2 + $0x8] ss:$16 sps:$4 sm:$0xff]   ;;  %1435 = vmatprep.subr.bf16.mxu1 %v3371_v1  ;;  %v3375_v4 = vld [vmem:[#allocation2 + $0x24] ss:$16 sps:$4 sm:$0xff]  }
  0x27   :  { %1272 = vmatpush1.bf16.msra.mxu0 %v3373_v2  ;;  %1436 = vmatpush1.bf16.msra.mxu1 %v3374_v3  ;;  %v3377_v5 = vld [vmem:[#allocation2 + $0x2c] ss:$16 sps:$4 sm:$0xff]   ;;  %v3379_v6 = vld [vmem:[#allocation2 + $0x20] ss:$16 sps:$4 sm:$0xff]   ;;  %v3380_v7 = vld [vmem:[#allocation2 + $0x28] ss:$16 sps:$4 sm:$0xff]  }
  0x28   :  { %1273 = vmatprep.subr.bf16.mxu0 %v3375_v4  ;;  %1437 = vmatprep.subr.bf16.mxu1 %v3377_v5  ;;  %v3381_v8 = vld [vmem:[#allocation2 + $0x44] ss:$16 sps:$4 sm:$0xff]   ;;  %v3383_v9 = vld [vmem:[#allocation2 + $0x4c] ss:$16 sps:$4 sm:$0xff]   ;;  %v3385_v10 = vld [vmem:[#allocation2 + $0x40] ss:$16 sps:$4 sm:$0xff]  }
  0x29   :  { %v3386_v11 = vld [vmem:[#allocation2 + $0x48] ss:$16 sps:$4 sm:$0xff]   ;;  %v3387_v12 = vld [vmem:[#allocation2 + $0x64] ss:$16 sps:$4 sm:$0xff]   ;;  %v3389_v13 = vld [vmem:[#allocation2 + $0x6c] ss:$16 sps:$4 sm:$0xff]  }
  0x2a   :  { %v3391_v14 = vld [vmem:[#allocation2 + $0x60] ss:$16 sps:$4 sm:$0xff]   ;;  %v3392_v15 = vld [vmem:[#allocation2 + $0x68] ss:$16 sps:$4 sm:$0xff]   ;;  %v3393_v16 = vld [vmem:[#allocation2 + $0x84] ss:$16 sps:$4 sm:$0xff]  }
  0x2b   :  { %1274 = vmatpush1.bf16.msra.mxu0 %v3379_v6  ;;  %1438 = vmatpush1.bf16.msra.mxu1 %v3380_v7  ;;  %v3395_v17 = vld [vmem:[#allocation2 + $0x8c] ss:$16 sps:$4 sm:$0xff]   ;;  %v3397_v18 = vld [vmem:[#allocation2 + $0x80] ss:$16 sps:$4 sm:$0xff]   ;;  %v3398_v19 = vld [vmem:[#allocation2 + $0x88] ss:$16 sps:$4 sm:$0xff]  }
  0x2c   :  { %1275 = vmatprep.subr.bf16.mxu0 %v3381_v8  ;;  %1439 = vmatprep.subr.bf16.mxu1 %v3383_v9  ;;  %v3399_v20 = vld [vmem:[#allocation2 + $0xa4] ss:$16 sps:$4 sm:$0xff]   ;;  %v3401_v21 = vld [vmem:[#allocation2 + $0xac] ss:$16 sps:$4 sm:$0xff]   ;;  %v3403_v22 = vld [vmem:[#allocation2 + $0xa0] ss:$16 sps:$4 sm:$0xff]  }
  0x2d   :  { %v3404_v23 = vld [vmem:[#allocation2 + $0xa8] ss:$16 sps:$4 sm:$0xff]   ;;  %v3405_v24 = vld [vmem:[#allocation2 + $0xc4] ss:$16 sps:$4 sm:$0xff]   ;;  %v3407_v25 = vld [vmem:[#allocation2 + $0xcc] ss:$16 sps:$4 sm:$0xff]  }
  0x2e   :  { %v3409_v26 = vld [vmem:[#allocation2 + $0xc0] ss:$16 sps:$4 sm:$0xff]   ;;  %v3410_v27 = vld [vmem:[#allocation2 + $0xc8] ss:$16 sps:$4 sm:$0xff]   ;;  %v3411_v28 = vld [vmem:[#allocation2 + $0xe4] ss:$16 sps:$4 sm:$0xff]  }
  0x2f   :  { %1276 = vmatpush1.bf16.msra.mxu0 %v3385_v10  ;;  %1440 = vmatpush1.bf16.msra.mxu1 %v3386_v11  ;;  %v3413_v29 = vld [vmem:[#allocation2 + $0xec] ss:$16 sps:$4 sm:$0xff]   ;;  %v3415_v30 = vld [vmem:[#allocation2 + $0xe0] ss:$16 sps:$4 sm:$0xff]   ;;  %v3416_v31 = vld [vmem:[#allocation2 + $0xe8] ss:$16 sps:$4 sm:$0xff]  }
  0x30   :  { %1277 = vmatprep.subr.bf16.mxu0 %v3387_v12  ;;  %1441 = vmatprep.subr.bf16.mxu1 %v3389_v13  ;;  %v3417_v32 = vld [vmem:[#allocation2 + $0x104] ss:$16 sps:$4 sm:$0xff]   ;;  %v3419_v33 = vld [vmem:[#allocation2 + $0x10c] ss:$16 sps:$4 sm:$0xff]   ;;  %v3421_v34 = vld [vmem:[#allocation2 + $0x100] ss:$16 sps:$4 sm:$0xff]  }
  0x31   :  { %v3422_v35 = vld [vmem:[#allocation2 + $0x108] ss:$16 sps:$4 sm:$0xff]   ;;  %v3423_v36 = vld [vmem:[#allocation2 + $0x124] ss:$16 sps:$4 sm:$0xff]   ;;  %v3425_v37 = vld [vmem:[#allocation2 + $0x12c] ss:$16 sps:$4 sm:$0xff]  }
  0x32   :  { %v3427_v38 = vld [vmem:[#allocation2 + $0x120] ss:$16 sps:$4 sm:$0xff]   ;;  %v3428_v39 = vld [vmem:[#allocation2 + $0x128] ss:$16 sps:$4 sm:$0xff]   ;;  %v3429_v40 = vld [vmem:[#allocation2 + $0x144] ss:$16 sps:$4 sm:$0xff]  }
  0x33   :  { %1278 = vmatpush1.bf16.msra.mxu0 %v3391_v14  ;;  %1442 = vmatpush1.bf16.msra.mxu1 %v3392_v15  ;;  %v3431_v41 = vld [vmem:[#allocation2 + $0x14c] ss:$16 sps:$4 sm:$0xff]   ;;  %v3433_v42 = vld [vmem:[#allocation2 + $0x140] ss:$16 sps:$4 sm:$0xff]   ;;  %v3434_v43 = vld [vmem:[#allocation2 + $0x148] ss:$16 sps:$4 sm:$0xff]  }
  0x34   :  { %1279 = vmatprep.subr.bf16.mxu0 %v3393_v16  ;;  %1443 = vmatprep.subr.bf16.mxu1 %v3395_v17  ;;  %v3435_v44 = vld [vmem:[#allocation2 + $0x164] ss:$16 sps:$4 sm:$0xff]   ;;  %v3437_v45 = vld [vmem:[#allocation2 + $0x16c] ss:$16 sps:$4 sm:$0xff]   ;;  %v3439_v47 = vld [vmem:[#allocation2 + $0x160] ss:$16 sps:$4 sm:$0xff]  }
  0x35   :  { %v56_v46 = vld [vmem:[%s4164_s0 + $0x8] sm:$0xff]  ;;  %v3441_v50 = vld [vmem:[#allocation2 + $0x184] ss:$16 sps:$4 sm:$0xff]   ;;  %v3445_v52 = vld [vmem:[#allocation2 + $0x180] ss:$16 sps:$4 sm:$0xff]   ;;  %vm1267_vm0 = vcmask 130048  }
  0x36   :  { %v63_v48 = vpack.c.bf16 %v56_v46, %v56_v46  ;;  %v3440_v49 = vld [vmem:[#allocation2 + $0x168] ss:$16 sps:$4 sm:$0xff]   ;;  %v3443_v51 = vld [vmem:[#allocation2 + $0x18c] ss:$16 sps:$4 sm:$0xff]   ;;  %v3447_v54 = vld [vmem:[#allocation2 + $0x1a4] ss:$16 sps:$4 sm:$0xff]  }
  0x37   :  { %1280 = vmatpush1.bf16.msra.mxu0 %v3397_v18  ;;  %1444 = vmatpush1.bf16.msra.mxu1 %v3398_v19  ;;  %v3446_v53 = vld [vmem:[#allocation2 + $0x188] ss:$16 sps:$4 sm:$0xff]   ;;  %v3449_v55 = vld [vmem:[#allocation2 + $0x1ac] ss:$16 sps:$4 sm:$0xff]   ;;  %v3451_v56 = vld [vmem:[#allocation2 + $0x1a0] ss:$16 sps:$4 sm:$0xff]  }
  0x38   :  { %1281 = vmatprep.subr.bf16.mxu0 %v3399_v20  ;;  %1445 = vmatprep.subr.bf16.mxu1 %v3401_v21  ;;  %v3452_v57 = vld [vmem:[#allocation2 + $0x1a8] ss:$16 sps:$4 sm:$0xff]   ;;  %v3453_v58 = vld [vmem:[#allocation2 + $0x1c4] ss:$16 sps:$4 sm:$0xff]   ;;  %v3455_v59 = vld [vmem:[#allocation2 + $0x1cc] ss:$16 sps:$4 sm:$0xff]  }
  0x39   :  { %1303 = vmatprep.mubr.bf16.mxu0 %v63_v48  ;;  %1467 = vmatprep.mubr.bf16.mxu1 %v63_v48  ;;  %v3457_v60 = vld [vmem:[#allocation2 + $0x1c0] ss:$16 sps:$4 sm:$0xff]   ;;  %v3458_v61 = vld [vmem:[#allocation2 + $0x1c8] ss:$16 sps:$4 sm:$0xff]   ;;  %v3459_v62 = vld [vmem:[#allocation2 + $0x1e4] ss:$16 sps:$4 sm:$0xff]  }
  0x3a   :  { %v3461_v63 = vld [vmem:[#allocation2 + $0x1ec] ss:$16 sps:$4 sm:$0xff]   ;;  %v3463_v0 = vld [vmem:[#allocation2 + $0x1e0] ss:$16 sps:$4 sm:$0xff]   ;;  %v3464_v1 = vld [vmem:[#allocation2 + $0x1e8] ss:$16 sps:$4 sm:$0xff]  }
  0x3b   :  { %1282 = vmatpush1.bf16.msra.mxu0 %v3403_v22  ;;  %1446 = vmatpush1.bf16.msra.mxu1 %v3404_v23  ;;  %v55_v2 = vld [vmem:[%s4164_s0] sm:$0xff]  ;;  %v3470_v4 = vld [vmem:[#allocation2 + $0x20c] ss:$16 sps:$4 sm:$0xff]   ;;  %v3468_v7 = vld [vmem:[#allocation2 + $0x208] ss:$16 sps:$4 sm:$0xff]  }
  0x3c   :  { %1283 = vmatprep.subr.bf16.mxu0 %v3405_v24  ;;  %1447 = vmatprep.subr.bf16.mxu1 %v3407_v25  ;;  %v3467_v3 = vld [vmem:[#allocation2 + $0x204] ss:$16 sps:$4 sm:$0xff]   ;;  %v62_v5 = vpack.c.bf16 %v55_v2, %v55_v2  ;;  %v3465_v6 = vld [vmem:[#allocation2 + $0x200] ss:$16 sps:$4 sm:$0xff]   ;;  %v3476_v9 = vld [vmem:[#allocation2 + $0x22c] ss:$16 sps:$4 sm:$0xff]  }
  0x3d   :  { %v3473_v8 = vld [vmem:[#allocation2 + $0x224] ss:$16 sps:$4 sm:$0xff]   ;;  %v3471_v10 = vld [vmem:[#allocation2 + $0x220] ss:$16 sps:$4 sm:$0xff]   ;;  %v3474_v11 = vld [vmem:[#allocation2 + $0x228] ss:$16 sps:$4 sm:$0xff]  }
  0x3e   :  { %v3479_v12 = vld [vmem:[#allocation2 + $0x244] ss:$16 sps:$4 sm:$0xff]   ;;  %v3482_v13 = vld [vmem:[#allocation2 + $0x24c] ss:$16 sps:$4 sm:$0xff]   ;;  %v3477_v14 = vld [vmem:[#allocation2 + $0x240] ss:$16 sps:$4 sm:$0xff]  }
  0x3f   :  { %1284 = vmatpush1.bf16.msra.mxu0 %v3409_v26  ;;  %1448 = vmatpush1.bf16.msra.mxu1 %v3410_v27  ;;  %v3480_v15 = vld [vmem:[#allocation2 + $0x248] ss:$16 sps:$4 sm:$0xff]   ;;  %v3485_v16 = vld [vmem:[#allocation2 + $0x264] ss:$16 sps:$4 sm:$0xff]   ;;  %v3488_v17 = vld [vmem:[#allocation2 + $0x26c] ss:$16 sps:$4 sm:$0xff]  }
  0x40   :  { %1285 = vmatprep.subr.bf16.mxu0 %v3411_v28  ;;  %1449 = vmatprep.subr.bf16.mxu1 %v3413_v29  ;;  %v3483_v18 = vld [vmem:[#allocation2 + $0x260] ss:$16 sps:$4 sm:$0xff]   ;;  %v3486_v19 = vld [vmem:[#allocation2 + $0x268] ss:$16 sps:$4 sm:$0xff]   ;;  %v3491_v20 = vld [vmem:[#allocation2 + $0x284] ss:$16 sps:$4 sm:$0xff]  }
  0x41   :  { %v3494_v21 = vld [vmem:[#allocation2 + $0x28c] ss:$16 sps:$4 sm:$0xff]   ;;  %v3489_v22 = vld [vmem:[#allocation2 + $0x280] ss:$16 sps:$4 sm:$0xff]   ;;  %v3492_v23 = vld [vmem:[#allocation2 + $0x288] ss:$16 sps:$4 sm:$0xff]  }
  0x42   :  { %v3497_v24 = vld [vmem:[#allocation2 + $0x2a4] ss:$16 sps:$4 sm:$0xff]   ;;  %v3500_v25 = vld [vmem:[#allocation2 + $0x2ac] ss:$16 sps:$4 sm:$0xff]   ;;  %v3495_v26 = vld [vmem:[#allocation2 + $0x2a0] ss:$16 sps:$4 sm:$0xff]  }
  0x43   :  { %1286 = vmatpush1.bf16.msra.mxu0 %v3415_v30  ;;  %1450 = vmatpush1.bf16.msra.mxu1 %v3416_v31  ;;  %v3498_v27 = vld [vmem:[#allocation2 + $0x2a8] ss:$16 sps:$4 sm:$0xff]   ;;  %v3503_v28 = vld [vmem:[#allocation2 + $0x2c4] ss:$16 sps:$4 sm:$0xff]   ;;  %v3506_v29 = vld [vmem:[#allocation2 + $0x2cc] ss:$16 sps:$4 sm:$0xff]  }
  0x44   :  { %1287 = vmatprep.subr.bf16.mxu0 %v3417_v32  ;;  %1451 = vmatprep.subr.bf16.mxu1 %v3419_v33  ;;  %v58_v30 = vld [vmem:[%s4164_s0 + $0x18] sm:$0xff]  ;;  %v3501_v31 = vld [vmem:[#allocation2 + $0x2c0] ss:$16 sps:$4 sm:$0xff]   ;;  %v3527_v46 = vld [vmem:[#allocation2 + $0x344] ss:$16 sps:$4 sm:$0xff]  }
  0x45   :  { %v65_v32 = vpack.c.bf16 %v58_v30, %v58_v30  ;;  %v3504_v33 = vld [vmem:[#allocation2 + $0x2c8] ss:$16 sps:$4 sm:$0xff]   ;;  %v3525_v48 = vld [vmem:[#allocation2 + $0x340] ss:$16 sps:$4 sm:$0xff]   ;;  %v3557_v2 = vld [vmem:[#allocation2 + $0x3e4] ss:$16 sps:$4 sm:$0xff]  }
  0x46   :  { %v3593_v30 = vld [vmem:[#allocation2 + $0x4a4] ss:$16 sps:$4 sm:$0xff]  }
  0x47   :  { %1288 = vmatpush1.bf16.msra.mxu0 %v3421_v34  ;;  %1452 = vmatpush1.bf16.msra.mxu1 %v3422_v35  ;;  %v3509_v34 = vld [vmem:[#allocation2 + $0x2e4] ss:$16 sps:$4 sm:$0xff]   ;;  %v3512_v35 = vld [vmem:[#allocation2 + $0x2ec] ss:$16 sps:$4 sm:$0xff]  }
  0x48   :  { %1289 = vmatprep.subr.bf16.mxu0 %v3423_v36  ;;  %1453 = vmatprep.subr.bf16.mxu1 %v3425_v37  ;;  %v3507_v36 = vld [vmem:[#allocation2 + $0x2e0] ss:$16 sps:$4 sm:$0xff]   ;;  %v3510_v37 = vld [vmem:[#allocation2 + $0x2e8] ss:$16 sps:$4 sm:$0xff]  }
  0x4b   :  { %1290 = vmatpush1.bf16.msra.mxu0 %v3427_v38  ;;  %1454 = vmatpush1.bf16.msra.mxu1 %v3428_v39  ;;  %v3515_v38 = vld [vmem:[#allocation2 + $0x304] ss:$16 sps:$4 sm:$0xff]   ;;  %v3518_v39 = vld [vmem:[#allocation2 + $0x30c] ss:$16 sps:$4 sm:$0xff]  }
  0x4c   :  { %1291 = vmatprep.subr.bf16.mxu0 %v3429_v40  ;;  %1455 = vmatprep.subr.bf16.mxu1 %v3431_v41  ;;  %v3513_v40 = vld [vmem:[#allocation2 + $0x300] ss:$16 sps:$4 sm:$0xff]   ;;  %v3516_v41 = vld [vmem:[#allocation2 + $0x308] ss:$16 sps:$4 sm:$0xff]  }
  0x4f   :  { %1292 = vmatpush1.bf16.msra.mxu0 %v3433_v42  ;;  %1456 = vmatpush1.bf16.msra.mxu1 %v3434_v43  ;;  %v3521_v42 = vld [vmem:[#allocation2 + $0x324] ss:$16 sps:$4 sm:$0xff]   ;;  %v3524_v43 = vld [vmem:[#allocation2 + $0x32c] ss:$16 sps:$4 sm:$0xff]  }
  0x50   :  { %1293 = vmatprep.subr.bf16.mxu0 %v3435_v44  ;;  %1457 = vmatprep.subr.bf16.mxu1 %v3437_v45  ;;  %v3519_v44 = vld [vmem:[#allocation2 + $0x320] ss:$16 sps:$4 sm:$0xff]   ;;  %v3522_v45 = vld [vmem:[#allocation2 + $0x328] ss:$16 sps:$4 sm:$0xff]  }
  0x53   :  { %1294 = vmatpush1.bf16.msra.mxu0 %v3439_v47  ;;  %1458 = vmatpush1.bf16.msra.mxu1 %v3440_v49  ;;  %v3530_v47 = vld [vmem:[#allocation2 + $0x34c] ss:$16 sps:$4 sm:$0xff]   ;;  %v3528_v49 = vld [vmem:[#allocation2 + $0x348] ss:$16 sps:$4 sm:$0xff]  }
  0x54   :  { %1295 = vmatprep.subr.bf16.mxu0 %v3441_v50  ;;  %1459 = vmatprep.subr.bf16.mxu1 %v3443_v51  ;;  %v3533_v50 = vld [vmem:[#allocation2 + $0x364] ss:$16 sps:$4 sm:$0xff]   ;;  %v3536_v51 = vld [vmem:[#allocation2 + $0x36c] ss:$16 sps:$4 sm:$0xff]  }
  0x57   :  { %1296 = vmatpush1.bf16.msra.mxu0 %v3445_v52  ;;  %1460 = vmatpush1.bf16.msra.mxu1 %v3446_v53  ;;  %v3531_v52 = vld [vmem:[#allocation2 + $0x360] ss:$16 sps:$4 sm:$0xff]   ;;  %v3534_v53 = vld [vmem:[#allocation2 + $0x368] ss:$16 sps:$4 sm:$0xff]  }
  0x58   :  { %1297 = vmatprep.subr.bf16.mxu0 %v3447_v54  ;;  %1461 = vmatprep.subr.bf16.mxu1 %v3449_v55  ;;  %v3539_v54 = vld [vmem:[#allocation2 + $0x384] ss:$16 sps:$4 sm:$0xff]   ;;  %v3542_v55 = vld [vmem:[#allocation2 + $0x38c] ss:$16 sps:$4 sm:$0xff]  }
  0x5b   :  { %1298 = vmatpush1.bf16.msra.mxu0 %v3451_v56  ;;  %1462 = vmatpush1.bf16.msra.mxu1 %v3452_v57  ;;  %v3537_v56 = vld [vmem:[#allocation2 + $0x380] ss:$16 sps:$4 sm:$0xff]   ;;  %v3540_v57 = vld [vmem:[#allocation2 + $0x388] ss:$16 sps:$4 sm:$0xff]  }
  0x5c   :  { %1299 = vmatprep.subr.bf16.mxu0 %v3453_v58  ;;  %1463 = vmatprep.subr.bf16.mxu1 %v3455_v59  ;;  %v3545_v58 = vld [vmem:[#allocation2 + $0x3a4] ss:$16 sps:$4 sm:$0xff]   ;;  %v3548_v59 = vld [vmem:[#allocation2 + $0x3ac] ss:$16 sps:$4 sm:$0xff]  }
  0x5f   :  { %1300 = vmatpush1.bf16.msra.mxu0 %v3457_v60  ;;  %1464 = vmatpush1.bf16.msra.mxu1 %v3458_v61  ;;  %v3543_v60 = vld [vmem:[#allocation2 + $0x3a0] ss:$16 sps:$4 sm:$0xff]   ;;  %v3546_v61 = vld [vmem:[#allocation2 + $0x3a8] ss:$16 sps:$4 sm:$0xff]  }
  0x60   :  { %1301 = vmatprep.subr.bf16.mxu0 %v3459_v62  ;;  %1465 = vmatprep.subr.bf16.mxu1 %v3461_v63  ;;  %v3551_v62 = vld [vmem:[#allocation2 + $0x3c4] ss:$16 sps:$4 sm:$0xff]   ;;  %v3554_v63 = vld [vmem:[#allocation2 + $0x3cc] ss:$16 sps:$4 sm:$0xff]  }
  0x63   :  { %1302 = vmatpush1.bf16.msra.mxu0 %v3463_v0  ;;  %1466 = vmatpush1.bf16.msra.mxu1 %v3464_v1  ;;  %v3549_v0 = vld [vmem:[#allocation2 + $0x3c0] ss:$16 sps:$4 sm:$0xff]   ;;  %v3552_v1 = vld [vmem:[#allocation2 + $0x3c8] ss:$16 sps:$4 sm:$0xff]  }
  0x64   :  { %1312 = vmatprep.subr.bf16.mxu0 %v3467_v3  ;;  %1476 = vmatprep.subr.bf16.mxu1 %v3470_v4  ;;  %v3560_v3 = vld [vmem:[#allocation2 + $0x3ec] ss:$16 sps:$4 sm:$0xff]   ;;  %v3555_v4 = vld [vmem:[#allocation2 + $0x3e0] ss:$16 sps:$4 sm:$0xff]  }
  0x66   :  { %1304 = vmatmul.mubr.bf16.vlgmr.msra.gmra.mrb[0].mxu0 %v62_v5  ;;  %1468 = vmatmul.mubr.bf16.vlgmr.msra.gmra.mrb[0].mxu1 %v62_v5  ;;  %v3558_v5 = vld [vmem:[#allocation2 + $0x3e8] ss:$16 sps:$4 sm:$0xff]  }
  0x67   :  { %1313 = vmatpush1.bf16.msra.mxu0 %v3465_v6  ;;  %1477 = vmatpush1.bf16.msra.mxu1 %v3468_v7  ;;  %v3563_v6 = vld [vmem:[#allocation2 + $0x404] ss:$16 sps:$4 sm:$0xff]  }
  0x68   :  { %1314 = vmatprep.subr.bf16.mxu0 %v3473_v8  ;;  %1478 = vmatprep.subr.bf16.mxu1 %v3476_v9  ;;  %v57_v7 = vld [vmem:[%s4164_s0 + $0x10] sm:$0xff]  ;;  %v3566_v8 = vld [vmem:[#allocation2 + $0x40c] ss:$16 sps:$4 sm:$0xff]  }
  0x69   :  { %1344 = vmatprep.mubr.bf16.mxu0 %v65_v32  ;;  %1508 = vmatprep.mubr.bf16.mxu1 %v65_v32  ;;  %v3561_v9 = vld [vmem:[#allocation2 + $0x400] ss:$16 sps:$4 sm:$0xff]  }
  0x6a   :  { %v3591_v32 = vld [vmem:[#allocation2 + $0x4a0] ss:$16 sps:$4 sm:$0xff]  }
  0x6b   :  { %1315 = vmatpush1.bf16.msra.mxu0 %v3471_v10  ;;  %1479 = vmatpush1.bf16.msra.mxu1 %v3474_v11  ;;  %v64_v10 = vpack.c.bf16 %v57_v7, %v57_v7  ;;  %v3564_v11 = vld [vmem:[#allocation2 + $0x408] ss:$16 sps:$4 sm:$0xff]   ;;  %v3656_v7 = vld [vmem:[#allocation2 + $0x5ec] ss:$16 sps:$4 sm:$0xff]  }
  0x6c   :  { %1316 = vmatprep.subr.bf16.mxu0 %v3479_v12  ;;  %1480 = vmatprep.subr.bf16.mxu1 %v3482_v13  ;;  %v3569_v12 = vld [vmem:[#allocation2 + $0x424] ss:$16 sps:$4 sm:$0xff]   ;;  %v3572_v13 = vld [vmem:[#allocation2 + $0x42c] ss:$16 sps:$4 sm:$0xff]  }
  0x6f   :  { %1317 = vmatpush1.bf16.msra.mxu0 %v3477_v14  ;;  %1481 = vmatpush1.bf16.msra.mxu1 %v3480_v15  ;;  %v60_v14 = vld [vmem:[%s4164_s0 + $0x28] sm:$0xff] }
  0x70   :  { %1318 = vmatprep.subr.bf16.mxu0 %v3485_v16  ;;  %1482 = vmatprep.subr.bf16.mxu1 %v3488_v17  ;;  %v67_v15 = vpack.c.bf16 %v60_v14, %v60_v14  ;;  %v3567_v16 = vld [vmem:[#allocation2 + $0x420] ss:$16 sps:$4 sm:$0xff]   ;;  %v3570_v17 = vld [vmem:[#allocation2 + $0x428] ss:$16 sps:$4 sm:$0xff]  }
  0x71   :  { %v3660_v14 = vld [vmem:[#allocation2 + $0x608] ss:$16 sps:$4 sm:$0xff]  }
  0x73   :  { %1319 = vmatpush1.bf16.msra.mxu0 %v3483_v18  ;;  %1483 = vmatpush1.bf16.msra.mxu1 %v3486_v19  ;;  %v3575_v18 = vld [vmem:[#allocation2 + $0x444] ss:$16 sps:$4 sm:$0xff]   ;;  %v3578_v19 = vld [vmem:[#allocation2 + $0x44c] ss:$16 sps:$4 sm:$0xff]  }
  0x74   :  { %1320 = vmatprep.subr.bf16.mxu0 %v3491_v20  ;;  %1484 = vmatprep.subr.bf16.mxu1 %v3494_v21  ;;  %v3573_v20 = vld [vmem:[#allocation2 + $0x440] ss:$16 sps:$4 sm:$0xff]   ;;  %v3576_v21 = vld [vmem:[#allocation2 + $0x448] ss:$16 sps:$4 sm:$0xff]  }
  0x77   :  { %1321 = vmatpush1.bf16.msra.mxu0 %v3489_v22  ;;  %1485 = vmatpush1.bf16.msra.mxu1 %v3492_v23  ;;  %v3581_v22 = vld [vmem:[#allocation2 + $0x464] ss:$16 sps:$4 sm:$0xff]   ;;  %v3584_v23 = vld [vmem:[#allocation2 + $0x46c] ss:$16 sps:$4 sm:$0xff]  }
  0x78   :  { %1322 = vmatprep.subr.bf16.mxu0 %v3497_v24  ;;  %1486 = vmatprep.subr.bf16.mxu1 %v3500_v25  ;;  %v3579_v24 = vld [vmem:[#allocation2 + $0x460] ss:$16 sps:$4 sm:$0xff]   ;;  %v3582_v25 = vld [vmem:[#allocation2 + $0x468] ss:$16 sps:$4 sm:$0xff]  }
  0x7b   :  { %1323 = vmatpush1.bf16.msra.mxu0 %v3495_v26  ;;  %1487 = vmatpush1.bf16.msra.mxu1 %v3498_v27  ;;  %v3587_v26 = vld [vmem:[#allocation2 + $0x484] ss:$16 sps:$4 sm:$0xff]   ;;  %v3590_v27 = vld [vmem:[#allocation2 + $0x48c] ss:$16 sps:$4 sm:$0xff]  }
  0x7c   :  { %1324 = vmatprep.subr.bf16.mxu0 %v3503_v28  ;;  %1488 = vmatprep.subr.bf16.mxu1 %v3506_v29  ;;  %v3585_v28 = vld [vmem:[#allocation2 + $0x480] ss:$16 sps:$4 sm:$0xff]   ;;  %v3588_v29 = vld [vmem:[#allocation2 + $0x488] ss:$16 sps:$4 sm:$0xff]  }
  0x7f   :  { %1325 = vmatpush1.bf16.msra.mxu0 %v3501_v31  ;;  %1489 = vmatpush1.bf16.msra.mxu1 %v3504_v33  ;;  %v3596_v31 = vld [vmem:[#allocation2 + $0x4ac] ss:$16 sps:$4 sm:$0xff]   ;;  %v3594_v33 = vld [vmem:[#allocation2 + $0x4a8] ss:$16 sps:$4 sm:$0xff]  }
  0x80   :  { %1326 = vmatprep.subr.bf16.mxu0 %v3509_v34  ;;  %1490 = vmatprep.subr.bf16.mxu1 %v3512_v35  ;;  %v3599_v34 = vld [vmem:[#allocation2 + $0x4c4] ss:$16 sps:$4 sm:$0xff]   ;;  %v3602_v35 = vld [vmem:[#allocation2 + $0x4cc] ss:$16 sps:$4 sm:$0xff]  }
  0x83   :  { %1327 = vmatpush1.bf16.msra.mxu0 %v3507_v36  ;;  %1491 = vmatpush1.bf16.msra.mxu1 %v3510_v37  ;;  %v3597_v36 = vld [vmem:[#allocation2 + $0x4c0] ss:$16 sps:$4 sm:$0xff]   ;;  %v3600_v37 = vld [vmem:[#allocation2 + $0x4c8] ss:$16 sps:$4 sm:$0xff]  }
  0x84   :  { %1328 = vmatprep.subr.bf16.mxu0 %v3515_v38  ;;  %1492 = vmatprep.subr.bf16.mxu1 %v3518_v39  ;;  %v3605_v38 = vld [vmem:[#allocation2 + $0x4e4] ss:$16 sps:$4 sm:$0xff]   ;;  %v3608_v39 = vld [vmem:[#allocation2 + $0x4ec] ss:$16 sps:$4 sm:$0xff]  }
  0x87   :  { %1329 = vmatpush1.bf16.msra.mxu0 %v3513_v40  ;;  %1493 = vmatpush1.bf16.msra.mxu1 %v3516_v41  ;;  %v3603_v40 = vld [vmem:[#allocation2 + $0x4e0] ss:$16 sps:$4 sm:$0xff]   ;;  %v3606_v41 = vld [vmem:[#allocation2 + $0x4e8] ss:$16 sps:$4 sm:$0xff]  }
  0x88   :  { %1330 = vmatprep.subr.bf16.mxu0 %v3521_v42  ;;  %1494 = vmatprep.subr.bf16.mxu1 %v3524_v43  ;;  %v3611_v42 = vld [vmem:[#allocation2 + $0x504] ss:$16 sps:$4 sm:$0xff]   ;;  %v3614_v43 = vld [vmem:[#allocation2 + $0x50c] ss:$16 sps:$4 sm:$0xff]  }
  0x8b   :  { %1331 = vmatpush1.bf16.msra.mxu0 %v3519_v44  ;;  %1495 = vmatpush1.bf16.msra.mxu1 %v3522_v45  ;;  %v3609_v44 = vld [vmem:[#allocation2 + $0x500] ss:$16 sps:$4 sm:$0xff]   ;;  %v3612_v45 = vld [vmem:[#allocation2 + $0x508] ss:$16 sps:$4 sm:$0xff]  }
  0x8c   :  { %1332 = vmatprep.subr.bf16.mxu0 %v3527_v46  ;;  %1496 = vmatprep.subr.bf16.mxu1 %v3530_v47  ;;  %v3617_v46 = vld [vmem:[#allocation2 + $0x524] ss:$16 sps:$4 sm:$0xff]   ;;  %v3620_v47 = vld [vmem:[#allocation2 + $0x52c] ss:$16 sps:$4 sm:$0xff]  }
  0x8f   :  { %1333 = vmatpush1.bf16.msra.mxu0 %v3525_v48  ;;  %1497 = vmatpush1.bf16.msra.mxu1 %v3528_v49  ;;  %v3615_v48 = vld [vmem:[#allocation2 + $0x520] ss:$16 sps:$4 sm:$0xff]   ;;  %v3618_v49 = vld [vmem:[#allocation2 + $0x528] ss:$16 sps:$4 sm:$0xff]  }
  0x90   :  { %1334 = vmatprep.subr.bf16.mxu0 %v3533_v50  ;;  %1498 = vmatprep.subr.bf16.mxu1 %v3536_v51  ;;  %v3623_v50 = vld [vmem:[#allocation2 + $0x544] ss:$16 sps:$4 sm:$0xff]   ;;  %v3626_v51 = vld [vmem:[#allocation2 + $0x54c] ss:$16 sps:$4 sm:$0xff]  }
  0x93   :  { %1335 = vmatpush1.bf16.msra.mxu0 %v3531_v52  ;;  %1499 = vmatpush1.bf16.msra.mxu1 %v3534_v53  ;;  %v3621_v52 = vld [vmem:[#allocation2 + $0x540] ss:$16 sps:$4 sm:$0xff]   ;;  %v3624_v53 = vld [vmem:[#allocation2 + $0x548] ss:$16 sps:$4 sm:$0xff]  }
  0x94   :  { %1336 = vmatprep.subr.bf16.mxu0 %v3539_v54  ;;  %1500 = vmatprep.subr.bf16.mxu1 %v3542_v55  ;;  %v3629_v54 = vld [vmem:[#allocation2 + $0x564] ss:$16 sps:$4 sm:$0xff]   ;;  %v3632_v55 = vld [vmem:[#allocation2 + $0x56c] ss:$16 sps:$4 sm:$0xff]  }
  0x97   :  { %1337 = vmatpush1.bf16.msra.mxu0 %v3537_v56  ;;  %1501 = vmatpush1.bf16.msra.mxu1 %v3540_v57  ;;  %v3627_v56 = vld [vmem:[#allocation2 + $0x560] ss:$16 sps:$4 sm:$0xff]   ;;  %v3630_v57 = vld [vmem:[#allocation2 + $0x568] ss:$16 sps:$4 sm:$0xff]  }
  0x98   :  { %1338 = vmatprep.subr.bf16.mxu0 %v3545_v58  ;;  %1502 = vmatprep.subr.bf16.mxu1 %v3548_v59  ;;  %v3635_v58 = vld [vmem:[#allocation2 + $0x584] ss:$16 sps:$4 sm:$0xff]   ;;  %v3638_v59 = vld [vmem:[#allocation2 + $0x58c] ss:$16 sps:$4 sm:$0xff]  }
  0x9b   :  { %1339 = vmatpush1.bf16.msra.mxu0 %v3543_v60  ;;  %1503 = vmatpush1.bf16.msra.mxu1 %v3546_v61  ;;  %v3633_v60 = vld [vmem:[#allocation2 + $0x580] ss:$16 sps:$4 sm:$0xff]   ;;  %v3636_v61 = vld [vmem:[#allocation2 + $0x588] ss:$16 sps:$4 sm:$0xff]  }
  0x9c   :  { %1340 = vmatprep.subr.bf16.mxu0 %v3551_v62  ;;  %1504 = vmatprep.subr.bf16.mxu1 %v3554_v63  ;;  %v3641_v62 = vld [vmem:[#allocation2 + $0x5a4] ss:$16 sps:$4 sm:$0xff]   ;;  %v3644_v63 = vld [vmem:[#allocation2 + $0x5ac] ss:$16 sps:$4 sm:$0xff]  }
  0x9f   :  { %1341 = vmatpush1.bf16.msra.mxu0 %v3549_v0  ;;  %1505 = vmatpush1.bf16.msra.mxu1 %v3552_v1  ;;  %v3639_v0 = vld [vmem:[#allocation2 + $0x5a0] ss:$16 sps:$4 sm:$0xff]   ;;  %v3642_v1 = vld [vmem:[#allocation2 + $0x5a8] ss:$16 sps:$4 sm:$0xff]  }
  0xa0   :  { %1342 = vmatprep.subr.bf16.mxu0 %v3557_v2  ;;  %1506 = vmatprep.subr.bf16.mxu1 %v3560_v3  ;;  %v3647_v2 = vld [vmem:[#allocation2 + $0x5c4] ss:$16 sps:$4 sm:$0xff]   ;;  %v3650_v3 = vld [vmem:[#allocation2 + $0x5cc] ss:$16 sps:$4 sm:$0xff]  }
  0xa3   :  { %1343 = vmatpush1.bf16.msra.mxu0 %v3555_v4  ;;  %1507 = vmatpush1.bf16.msra.mxu1 %v3558_v5  ;;  %v3645_v4 = vld [vmem:[#allocation2 + $0x5c0] ss:$16 sps:$4 sm:$0xff]   ;;  %v3648_v5 = vld [vmem:[#allocation2 + $0x5c8] ss:$16 sps:$4 sm:$0xff]  }
  0xa4   :  { %1353 = vmatprep.subr.bf16.mxu0 %v3563_v6  ;;  %1517 = vmatprep.subr.bf16.mxu1 %v3566_v8  ;;  %v3653_v6 = vld [vmem:[#allocation2 + $0x5e4] ss:$16 sps:$4 sm:$0xff]   ;;  %v3651_v8 = vld [vmem:[#allocation2 + $0x5e0] ss:$16 sps:$4 sm:$0xff]  }
  0xa6   :  { %1345 = vmatmul.mubr.bf16.vlgmr.msra.gmra.mrb[0].mxu0 %v64_v10  ;;  %1509 = vmatmul.mubr.bf16.vlgmr.msra.gmra.mrb[0].mxu1 %v64_v10  ;;  %v59_v10 = vld [vmem:[%s4164_s0 + $0x20] sm:$0xff] }
  0xa7   :  { %1354 = vmatpush1.bf16.msra.mxu0 %v3561_v9  ;;  %1518 = vmatpush1.bf16.msra.mxu1 %v3564_v11  ;;  %v3654_v9 = vld [vmem:[#allocation2 + $0x5e8] ss:$16 sps:$4 sm:$0xff]   ;;  %v3659_v11 = vld [vmem:[#allocation2 + $0x604] ss:$16 sps:$4 sm:$0xff]  }
  0xa8   :  { %1355 = vmatprep.subr.bf16.mxu0 %v3569_v12  ;;  %1519 = vmatprep.subr.bf16.mxu1 %v3572_v13  ;;  %v3662_v12 = vld [vmem:[#allocation2 + $0x60c] ss:$16 sps:$4 sm:$0xff]   ;;  %v3657_v13 = vld [vmem:[#allocation2 + $0x600] ss:$16 sps:$4 sm:$0xff]  }
  0xa9   :  { %1385 = vmatprep.mubr.bf16.mxu0 %v67_v15  ;;  %1549 = vmatprep.mubr.bf16.mxu1 %v67_v15  ;;  %v66_v15 = vpack.c.bf16 %v59_v10, %v59_v10  ;;  %v3744_v10 = vld [vmem:[#allocation4 + $0x1a8] ss:$16 sps:$4 sm:$0xff]  }
  0xab   :  { %1356 = vmatpush1.bf16.msra.mxu0 %v3567_v16  ;;  %1520 = vmatpush1.bf16.msra.mxu1 %v3570_v17  ;;  %v3665_v16 = vld [vmem:[#allocation4 + $0x4] ss:$16 sps:$4 sm:$0xff]   ;;  %v3668_v17 = vld [vmem:[#allocation4 + $0xc] ss:$16 sps:$4 sm:$0xff]  }
  0xac   :  { %1357 = vmatprep.subr.bf16.mxu0 %v3575_v18  ;;  %1521 = vmatprep.subr.bf16.mxu1 %v3578_v19  ;;  %v3939_v18 = vmov 0   ;;  %v61_v19 = vld [vmem:[%s4164_s0 + $0x30] sm:$0xff] }
  0xaf   :  { %1358 = vmatpush1.bf16.msra.mxu0 %v3573_v20  ;;  %1522 = vmatpush1.bf16.msra.mxu1 %v3576_v21  ;;  %v3663_v20 = vld [vmem:[#allocation4] ss:$16 sps:$4 sm:$0xff]   ;;  %v3666_v21 = vld [vmem:[#allocation4 + $0x8] ss:$16 sps:$4 sm:$0xff]  }
  0xb0   :  { %1359 = vmatprep.subr.bf16.mxu0 %v3581_v22  ;;  %1523 = vmatprep.subr.bf16.mxu1 %v3584_v23  ;;  %v68_v22 = vpack.c.bf16 %v61_v19, %v61_v19  ;;  %v3671_v23 = vld [vmem:[#allocation4 + $0x24] ss:$16 sps:$4 sm:$0xff]  }
  0xb1   :  { %v3761_v19 = vld [vmem:[#allocation4 + $0x204] ss:$16 sps:$4 sm:$0xff]  }
  0xb3   :  { %1360 = vmatpush1.bf16.msra.mxu0 %v3579_v24  ;;  %1524 = vmatpush1.bf16.msra.mxu1 %v3582_v25  ;;  %v3674_v24 = vld [vmem:[#allocation4 + $0x2c] ss:$16 sps:$4 sm:$0xff]   ;;  %v3669_v25 = vld [vmem:[#allocation4 + $0x20] ss:$16 sps:$4 sm:$0xff]  }
  0xb4   :  { %1361 = vmatprep.subr.bf16.mxu0 %v3587_v26  ;;  %1525 = vmatprep.subr.bf16.mxu1 %v3590_v27  ;;  %v3672_v26 = vld [vmem:[#allocation4 + $0x28] ss:$16 sps:$4 sm:$0xff]   ;;  %v3677_v27 = vld [vmem:[#allocation4 + $0x44] ss:$16 sps:$4 sm:$0xff]  }
  0xb7   :  { %1362 = vmatpush1.bf16.msra.mxu0 %v3585_v28  ;;  %1526 = vmatpush1.bf16.msra.mxu1 %v3588_v29  ;;  %v3680_v28 = vld [vmem:[#allocation4 + $0x4c] ss:$16 sps:$4 sm:$0xff]   ;;  %v3675_v29 = vld [vmem:[#allocation4 + $0x40] ss:$16 sps:$4 sm:$0xff]  }
  0xb8   :  { %1363 = vmatprep.subr.bf16.mxu0 %v3593_v30  ;;  %1527 = vmatprep.subr.bf16.mxu1 %v3596_v31  ;;  %v3678_v30 = vld [vmem:[#allocation4 + $0x48] ss:$16 sps:$4 sm:$0xff]   ;;  %v3683_v31 = vld [vmem:[#allocation4 + $0x64] ss:$16 sps:$4 sm:$0xff]  }
  0xbb   :  { %1364 = vmatpush1.bf16.msra.mxu0 %v3591_v32  ;;  %1528 = vmatpush1.bf16.msra.mxu1 %v3594_v33  ;;  %v3686_v32 = vld [vmem:[#allocation4 + $0x6c] ss:$16 sps:$4 sm:$0xff]   ;;  %v3681_v33 = vld [vmem:[#allocation4 + $0x60] ss:$16 sps:$4 sm:$0xff]  }
  0xbc   :  { %1365 = vmatprep.subr.bf16.mxu0 %v3599_v34  ;;  %1529 = vmatprep.subr.bf16.mxu1 %v3602_v35  ;;  %v3684_v34 = vld [vmem:[#allocation4 + $0x68] ss:$16 sps:$4 sm:$0xff]   ;;  %v3689_v35 = vld [vmem:[#allocation4 + $0x84] ss:$16 sps:$4 sm:$0xff]  }
  0xbf   :  { %1366 = vmatpush1.bf16.msra.mxu0 %v3597_v36  ;;  %1530 = vmatpush1.bf16.msra.mxu1 %v3600_v37  ;;  %v3692_v36 = vld [vmem:[#allocation4 + $0x8c] ss:$16 sps:$4 sm:$0xff]   ;;  %v3687_v37 = vld [vmem:[#allocation4 + $0x80] ss:$16 sps:$4 sm:$0xff]  }
  0xc0   :  { %1367 = vmatprep.subr.bf16.mxu0 %v3605_v38  ;;  %1531 = vmatprep.subr.bf16.mxu1 %v3608_v39  ;;  %v3690_v38 = vld [vmem:[#allocation4 + $0x88] ss:$16 sps:$4 sm:$0xff]   ;;  %v3695_v39 = vld [vmem:[#allocation4 + $0xa4] ss:$16 sps:$4 sm:$0xff]  }
  0xc3   :  { %1368 = vmatpush1.bf16.msra.mxu0 %v3603_v40  ;;  %1532 = vmatpush1.bf16.msra.mxu1 %v3606_v41  ;;  %v3698_v40 = vld [vmem:[#allocation4 + $0xac] ss:$16 sps:$4 sm:$0xff]   ;;  %v3693_v41 = vld [vmem:[#allocation4 + $0xa0] ss:$16 sps:$4 sm:$0xff]  }
  0xc4   :  { %1369 = vmatprep.subr.bf16.mxu0 %v3611_v42  ;;  %1533 = vmatprep.subr.bf16.mxu1 %v3614_v43  ;;  %v3696_v42 = vld [vmem:[#allocation4 + $0xa8] ss:$16 sps:$4 sm:$0xff]   ;;  %v3701_v43 = vld [vmem:[#allocation4 + $0xc4] ss:$16 sps:$4 sm:$0xff]  }
  0xc7   :  { %1370 = vmatpush1.bf16.msra.mxu0 %v3609_v44  ;;  %1534 = vmatpush1.bf16.msra.mxu1 %v3612_v45  ;;  %v3704_v44 = vld [vmem:[#allocation4 + $0xcc] ss:$16 sps:$4 sm:$0xff]   ;;  %v3699_v45 = vld [vmem:[#allocation4 + $0xc0] ss:$16 sps:$4 sm:$0xff]  }
  0xc8   :  { %1371 = vmatprep.subr.bf16.mxu0 %v3617_v46  ;;  %1535 = vmatprep.subr.bf16.mxu1 %v3620_v47  ;;  %v3702_v46 = vld [vmem:[#allocation4 + $0xc8] ss:$16 sps:$4 sm:$0xff]   ;;  %v3707_v47 = vld [vmem:[#allocation4 + $0xe4] ss:$16 sps:$4 sm:$0xff]  }
  0xcb   :  { %1372 = vmatpush1.bf16.msra.mxu0 %v3615_v48  ;;  %1536 = vmatpush1.bf16.msra.mxu1 %v3618_v49  ;;  %v3710_v48 = vld [vmem:[#allocation4 + $0xec] ss:$16 sps:$4 sm:$0xff]   ;;  %v3705_v49 = vld [vmem:[#allocation4 + $0xe0] ss:$16 sps:$4 sm:$0xff]  }
  0xcc   :  { %1373 = vmatprep.subr.bf16.mxu0 %v3623_v50  ;;  %1537 = vmatprep.subr.bf16.mxu1 %v3626_v51  ;;  %v3708_v50 = vld [vmem:[#allocation4 + $0xe8] ss:$16 sps:$4 sm:$0xff]   ;;  %v3713_v51 = vld [vmem:[#allocation4 + $0x104] ss:$16 sps:$4 sm:$0xff]  }
  0xcf   :  { %1374 = vmatpush1.bf16.msra.mxu0 %v3621_v52  ;;  %1538 = vmatpush1.bf16.msra.mxu1 %v3624_v53  ;;  %v3716_v52 = vld [vmem:[#allocation4 + $0x10c] ss:$16 sps:$4 sm:$0xff]   ;;  %v3711_v53 = vld [vmem:[#allocation4 + $0x100] ss:$16 sps:$4 sm:$0xff]  }
  0xd0   :  { %1375 = vmatprep.subr.bf16.mxu0 %v3629_v54  ;;  %1539 = vmatprep.subr.bf16.mxu1 %v3632_v55  ;;  %v3714_v54 = vld [vmem:[#allocation4 + $0x108] ss:$16 sps:$4 sm:$0xff]   ;;  %v3719_v55 = vld [vmem:[#allocation4 + $0x124] ss:$16 sps:$4 sm:$0xff]  }
  0xd3   :  { %1376 = vmatpush1.bf16.msra.mxu0 %v3627_v56  ;;  %1540 = vmatpush1.bf16.msra.mxu1 %v3630_v57  ;;  %v3722_v56 = vld [vmem:[#allocation4 + $0x12c] ss:$16 sps:$4 sm:$0xff]   ;;  %v3717_v57 = vld [vmem:[#allocation4 + $0x120] ss:$16 sps:$4 sm:$0xff]  }
  0xd4   :  { %1377 = vmatprep.subr.bf16.mxu0 %v3635_v58  ;;  %1541 = vmatprep.subr.bf16.mxu1 %v3638_v59  ;;  %v3720_v58 = vld [vmem:[#allocation4 + $0x128] ss:$16 sps:$4 sm:$0xff]   ;;  %v3725_v59 = vld [vmem:[#allocation4 + $0x144] ss:$16 sps:$4 sm:$0xff]  }
  0xd7   :  { %1378 = vmatpush1.bf16.msra.mxu0 %v3633_v60  ;;  %1542 = vmatpush1.bf16.msra.mxu1 %v3636_v61  ;;  %v3728_v60 = vld [vmem:[#allocation4 + $0x14c] ss:$16 sps:$4 sm:$0xff]   ;;  %v3723_v61 = vld [vmem:[#allocation4 + $0x140] ss:$16 sps:$4 sm:$0xff]  }
  0xd8   :  { %1379 = vmatprep.subr.bf16.mxu0 %v3641_v62  ;;  %1543 = vmatprep.subr.bf16.mxu1 %v3644_v63  ;;  %v3726_v62 = vld [vmem:[#allocation4 + $0x148] ss:$16 sps:$4 sm:$0xff]   ;;  %v3731_v63 = vld [vmem:[#allocation4 + $0x164] ss:$16 sps:$4 sm:$0xff]  }
  0xdb   :  { %1380 = vmatpush1.bf16.msra.mxu0 %v3639_v0  ;;  %1544 = vmatpush1.bf16.msra.mxu1 %v3642_v1  ;;  %v3734_v0 = vld [vmem:[#allocation4 + $0x16c] ss:$16 sps:$4 sm:$0xff]   ;;  %v3729_v1 = vld [vmem:[#allocation4 + $0x160] ss:$16 sps:$4 sm:$0xff]  }
  0xdc   :  { %1381 = vmatprep.subr.bf16.mxu0 %v3647_v2  ;;  %1545 = vmatprep.subr.bf16.mxu1 %v3650_v3  ;;  %v3732_v2 = vld [vmem:[#allocation4 + $0x168] ss:$16 sps:$4 sm:$0xff]   ;;  %v3737_v3 = vld [vmem:[#allocation4 + $0x184] ss:$16 sps:$4 sm:$0xff]  }
  0xdf   :  { %1382 = vmatpush1.bf16.msra.mxu0 %v3645_v4  ;;  %1546 = vmatpush1.bf16.msra.mxu1 %v3648_v5  ;;  %v3740_v4 = vld [vmem:[#allocation4 + $0x18c] ss:$16 sps:$4 sm:$0xff]   ;;  %v3735_v5 = vld [vmem:[#allocation4 + $0x180] ss:$16 sps:$4 sm:$0xff]  }
  0xe0   :  { %1383 = vmatprep.subr.bf16.mxu0 %v3653_v6  ;;  %1547 = vmatprep.subr.bf16.mxu1 %v3656_v7  ;;  %v3738_v6 = vld [vmem:[#allocation4 + $0x188] ss:$16 sps:$4 sm:$0xff]   ;;  %v3743_v7 = vld [vmem:[#allocation4 + $0x1a4] ss:$16 sps:$4 sm:$0xff]  }
  0xe3   :  { %1384 = vmatpush1.bf16.msra.mxu0 %v3651_v8  ;;  %1548 = vmatpush1.bf16.msra.mxu1 %v3654_v9  ;;  %v3746_v8 = vld [vmem:[#allocation4 + $0x1ac] ss:$16 sps:$4 sm:$0xff]   ;;  %v3741_v9 = vld [vmem:[#allocation4 + $0x1a0] ss:$16 sps:$4 sm:$0xff]  }
  0xe4   :  { %1394 = vmatprep.subr.bf16.mxu0 %v3659_v11  ;;  %1558 = vmatprep.subr.bf16.mxu1 %v3662_v12  ;;  %v3749_v11 = vld [vmem:[#allocation4 + $0x1c4] ss:$16 sps:$4 sm:$0xff]   ;;  %v3752_v12 = vld [vmem:[#allocation4 + $0x1cc] ss:$16 sps:$4 sm:$0xff]  }
  0xe6   :  { %1386 = vmatmul.mubr.bf16.vlgmr.msra.gmra.mrb[0].mxu0 %v66_v15  ;;  %1550 = vmatmul.mubr.bf16.vlgmr.msra.gmra.mrb[0].mxu1 %v66_v15  ;;  %v3755_v15 = vld [vmem:[#allocation4 + $0x1e4] ss:$16 sps:$4 sm:$0xff]  }
  0xe7   :  { %1395 = vmatpush1.bf16.msra.mxu0 %v3657_v13  ;;  %1559 = vmatpush1.bf16.msra.mxu1 %v3660_v14  ;;  %v3747_v13 = vld [vmem:[#allocation4 + $0x1c0] ss:$16 sps:$4 sm:$0xff]   ;;  %v3750_v14 = vld [vmem:[#allocation4 + $0x1c8] ss:$16 sps:$4 sm:$0xff]  }
  0xe8   :  { %1426 = vmatprep.mubr.bf16.mxu0 %v3939_v18  ;;  %1590 = vmatprep.mubr.bf16.mxu1 %v3939_v18  ;;  %v3756_v18 = vld [vmem:[#allocation4 + $0x1e8] ss:$16 sps:$4 sm:$0xff]  }
  0xe9   :  { %2397 = vmatprep.subr.bf16.mxu0 %v3665_v16  ;;  %2479 = vmatprep.subr.bf16.mxu1 %v3668_v17  ;;  %v3758_v16 = vld [vmem:[#allocation4 + $0x1ec] ss:$16 sps:$4 sm:$0xff]   ;;  %v3753_v17 = vld [vmem:[#allocation4 + $0x1e0] ss:$16 sps:$4 sm:$0xff]  }
  0xf2   :  { %3117 = vmatmul.mubr.msk.bf16.vlgmr.msra.gmra.mrb[0].mxu0 %vm1267_vm0, %v68_v22  ;;  %3118 = vmatmul.mubr.msk.bf16.vlgmr.msra.gmra.mrb[0].mxu1 %vm1267_vm0, %v68_v22 }
  0xf3   :  { %2398 = vmatpush1.bf16.msra.mxu0 %v3663_v20  ;;  %2480 = vmatpush1.bf16.msra.mxu1 %v3666_v21  ;;  %v3764_v20 = vld [vmem:[#allocation4 + $0x20c] ss:$16 sps:$4 sm:$0xff]   ;;  %v267_v21 = vlaneseq }
  0xf4   :  { %2399 = vmatprep.subr.bf16.mxu0 %v3671_v23  ;;  %2481 = vmatprep.subr.bf16.mxu1 %v3674_v24  ;;  %v4031_v24 = vld [vmem:[%s4166_s2] sm:$0xf] }
  0xf5   :  { %v4025_v22 = vshrl.u32 %v267_v21, 7  ;;  %v3821_v21 = vld [vmem:[#allocation4 + $0x344] ss:$16 sps:$4 sm:$0xff]  }
  0xf7   :  { %2400 = vmatpush1.bf16.msra.mxu0 %v3669_v25  ;;  %2482 = vmatpush1.bf16.msra.mxu1 %v3672_v26  ;;  %v269_v23 = vsub.s32 0, %v4025_v22  ;;  %v273_v25 = vsub.s32 1, %v4025_v22  ;;  %v281_v26 = vsub.s32 3, %v4025_v22 }
  0xf8   :  { %2401 = vmatprep.subr.bf16.mxu0 %v3677_v27  ;;  %2483 = vmatprep.subr.bf16.mxu1 %v3680_v28 }
  0xf9   :  { %v270_v27 = vrot.slane %v4031_v24, %v269_v23  ;;  %v274_v28 = vrot.slane %v4031_v24, %v273_v25 }
  0xfb   :  { %2402 = vmatpush1.bf16.msra.mxu0 %v3675_v29  ;;  %2484 = vmatpush1.bf16.msra.mxu1 %v3678_v30  ;;  %v282_v29 = vrot.slane %v4031_v24, %v281_v26 }
  0xfc   :  { %2403 = vmatprep.subr.bf16.mxu0 %v3683_v31  ;;  %2485 = vmatprep.subr.bf16.mxu1 %v3686_v32 }
  0xff   :  { %2404 = vmatpush1.bf16.msra.mxu0 %v3681_v33  ;;  %2486 = vmatpush1.bf16.msra.mxu1 %v3684_v34 }
 0x100   :  { %2405 = vmatprep.subr.bf16.mxu0 %v3689_v35  ;;  %2487 = vmatprep.subr.bf16.mxu1 %v3692_v36 }
 0x103   :  { %2406 = vmatpush1.bf16.msra.mxu0 %v3687_v37  ;;  %2488 = vmatpush1.bf16.msra.mxu1 %v3690_v38 }
 0x104   :  { %2407 = vmatprep.subr.bf16.mxu0 %v3695_v39  ;;  %2489 = vmatprep.subr.bf16.mxu1 %v3698_v40 }
 0x107   :  { %2408 = vmatpush1.bf16.msra.mxu0 %v3693_v41  ;;  %2490 = vmatpush1.bf16.msra.mxu1 %v3696_v42 }
 0x108   :  { %2409 = vmatprep.subr.bf16.mxu0 %v3701_v43  ;;  %2491 = vmatprep.subr.bf16.mxu1 %v3704_v44 }
 0x10b   :  { %2410 = vmatpush1.bf16.msra.mxu0 %v3699_v45  ;;  %2492 = vmatpush1.bf16.msra.mxu1 %v3702_v46  ;;  %v3759_v45 = vld [vmem:[#allocation4 + $0x200] ss:$16 sps:$4 sm:$0xff]   ;;  %v3762_v46 = vld [vmem:[#allocation4 + $0x208] ss:$16 sps:$4 sm:$0xff]  }
 0x10c   :  { %2411 = vmatprep.subr.bf16.mxu0 %v3707_v47  ;;  %2493 = vmatprep.subr.bf16.mxu1 %v3710_v48  ;;  %v3767_v48 = vld [vmem:[#allocation4 + $0x224] ss:$16 sps:$4 sm:$0xff]  }
 0x10f   :  { %2412 = vmatpush1.bf16.msra.mxu0 %v3705_v49  ;;  %2494 = vmatpush1.bf16.msra.mxu1 %v3708_v50  ;;  %v3770_v49 = vld [vmem:[#allocation4 + $0x22c] ss:$16 sps:$4 sm:$0xff]  }
 0x110   :  { %2413 = vmatprep.subr.bf16.mxu0 %v3713_v51  ;;  %2495 = vmatprep.subr.bf16.mxu1 %v3716_v52  ;;  %v3765_v51 = vld [vmem:[#allocation4 + $0x220] ss:$16 sps:$4 sm:$0xff]   ;;  %v3768_v52 = vld [vmem:[#allocation4 + $0x228] ss:$16 sps:$4 sm:$0xff]  }
 0x113   :  { %2414 = vmatpush1.bf16.msra.mxu0 %v3711_v53  ;;  %2496 = vmatpush1.bf16.msra.mxu1 %v3714_v54  ;;  %v3773_v53 = vld [vmem:[#allocation4 + $0x244] ss:$16 sps:$4 sm:$0xff]   ;;  %v3776_v54 = vld [vmem:[#allocation4 + $0x24c] ss:$16 sps:$4 sm:$0xff]  }
 0x114   :  { %2415 = vmatprep.subr.bf16.mxu0 %v3719_v55  ;;  %2497 = vmatprep.subr.bf16.mxu1 %v3722_v56  ;;  %v3771_v55 = vld [vmem:[#allocation4 + $0x240] ss:$16 sps:$4 sm:$0xff]   ;;  %v3774_v56 = vld [vmem:[#allocation4 + $0x248] ss:$16 sps:$4 sm:$0xff]  }
 0x117   :  { %2416 = vmatpush1.bf16.msra.mxu0 %v3717_v57  ;;  %2498 = vmatpush1.bf16.msra.mxu1 %v3720_v58  ;;  %v3779_v57 = vld [vmem:[#allocation4 + $0x264] ss:$16 sps:$4 sm:$0xff]   ;;  %v3782_v58 = vld [vmem:[#allocation4 + $0x26c] ss:$16 sps:$4 sm:$0xff]  }
 0x118   :  { %2417 = vmatprep.subr.bf16.mxu0 %v3725_v59  ;;  %2499 = vmatprep.subr.bf16.mxu1 %v3728_v60  ;;  %v3777_v59 = vld [vmem:[#allocation4 + $0x260] ss:$16 sps:$4 sm:$0xff]   ;;  %v3780_v60 = vld [vmem:[#allocation4 + $0x268] ss:$16 sps:$4 sm:$0xff]  }
 0x11b   :  { %2418 = vmatpush1.bf16.msra.mxu0 %v3723_v61  ;;  %2500 = vmatpush1.bf16.msra.mxu1 %v3726_v62  ;;  %v3785_v61 = vld [vmem:[#allocation4 + $0x284] ss:$16 sps:$4 sm:$0xff]   ;;  %v3788_v62 = vld [vmem:[#allocation4 + $0x28c] ss:$16 sps:$4 sm:$0xff]  }
 0x11c   :  { %2419 = vmatprep.subr.bf16.mxu0 %v3731_v63  ;;  %2501 = vmatprep.subr.bf16.mxu1 %v3734_v0  ;;  %v3783_v63 = vld [vmem:[#allocation4 + $0x280] ss:$16 sps:$4 sm:$0xff]   ;;  %v3786_v0 = vld [vmem:[#allocation4 + $0x288] ss:$16 sps:$4 sm:$0xff]  }
 0x11f   :  { %2420 = vmatpush1.bf16.msra.mxu0 %v3729_v1  ;;  %2502 = vmatpush1.bf16.msra.mxu1 %v3732_v2  ;;  %v3791_v1 = vld [vmem:[#allocation4 + $0x2a4] ss:$16 sps:$4 sm:$0xff]   ;;  %v3794_v2 = vld [vmem:[#allocation4 + $0x2ac] ss:$16 sps:$4 sm:$0xff]  }
 0x120   :  { %2421 = vmatprep.subr.bf16.mxu0 %v3737_v3  ;;  %2503 = vmatprep.subr.bf16.mxu1 %v3740_v4  ;;  %v3789_v3 = vld [vmem:[#allocation4 + $0x2a0] ss:$16 sps:$4 sm:$0xff]   ;;  %v3792_v4 = vld [vmem:[#allocation4 + $0x2a8] ss:$16 sps:$4 sm:$0xff]  }
 0x123   :  { %2422 = vmatpush1.bf16.msra.mxu0 %v3735_v5  ;;  %2504 = vmatpush1.bf16.msra.mxu1 %v3738_v6  ;;  %v3797_v5 = vld [vmem:[#allocation4 + $0x2c4] ss:$16 sps:$4 sm:$0xff]   ;;  %v3800_v6 = vld [vmem:[#allocation4 + $0x2cc] ss:$16 sps:$4 sm:$0xff]  }
 0x124   :  { %2423 = vmatprep.subr.bf16.mxu0 %v3743_v7  ;;  %2505 = vmatprep.subr.bf16.mxu1 %v3746_v8  ;;  %v3795_v7 = vld [vmem:[#allocation4 + $0x2c0] ss:$16 sps:$4 sm:$0xff]   ;;  %v3798_v8 = vld [vmem:[#allocation4 + $0x2c8] ss:$16 sps:$4 sm:$0xff]  }
 0x127   :  { %2424 = vmatpush1.bf16.msra.mxu0 %v3741_v9  ;;  %2506 = vmatpush1.bf16.msra.mxu1 %v3744_v10  ;;  %v3803_v9 = vld [vmem:[#allocation4 + $0x2e4] ss:$16 sps:$4 sm:$0xff]   ;;  %v3806_v10 = vld [vmem:[#allocation4 + $0x2ec] ss:$16 sps:$4 sm:$0xff]  }
 0x128   :  { %2425 = vmatprep.subr.bf16.mxu0 %v3749_v11  ;;  %2507 = vmatprep.subr.bf16.mxu1 %v3752_v12  ;;  %v3801_v11 = vld [vmem:[#allocation4 + $0x2e0] ss:$16 sps:$4 sm:$0xff]   ;;  %v3804_v12 = vld [vmem:[#allocation4 + $0x2e8] ss:$16 sps:$4 sm:$0xff]  }
 0x12b   :  { %2426 = vmatpush1.bf16.msra.mxu0 %v3747_v13  ;;  %2508 = vmatpush1.bf16.msra.mxu1 %v3750_v14  ;;  %v3809_v13 = vld [vmem:[#allocation4 + $0x304] ss:$16 sps:$4 sm:$0xff]   ;;  %v3812_v14 = vld [vmem:[#allocation4 + $0x30c] ss:$16 sps:$4 sm:$0xff]  }
 0x12c   :  { %2427 = vmatprep.subr.bf16.mxu0 %v3755_v15  ;;  %2509 = vmatprep.subr.bf16.mxu1 %v3758_v16  ;;  %v3807_v15 = vld [vmem:[#allocation4 + $0x300] ss:$16 sps:$4 sm:$0xff]   ;;  %v3810_v16 = vld [vmem:[#allocation4 + $0x308] ss:$16 sps:$4 sm:$0xff]  }
 0x12f   :  { %2428 = vmatpush1.bf16.msra.mxu0 %v3753_v17  ;;  %2510 = vmatpush1.bf16.msra.mxu1 %v3756_v18  ;;  %v3815_v17 = vld [vmem:[#allocation4 + $0x324] ss:$16 sps:$4 sm:$0xff]   ;;  %v3818_v18 = vld [vmem:[#allocation4 + $0x32c] ss:$16 sps:$4 sm:$0xff]  }
 0x130   :  { %2438 = vmatprep.subr.bf16.mxu0 %v3761_v19  ;;  %2520 = vmatprep.subr.bf16.mxu1 %v3764_v20  ;;  %v3813_v19 = vld [vmem:[#allocation4 + $0x320] ss:$16 sps:$4 sm:$0xff]   ;;  %v3816_v20 = vld [vmem:[#allocation4 + $0x328] ss:$16 sps:$4 sm:$0xff]  }
 0x1c5   :  { %v1428_v30 = vpop.f32.mrb[0].mxu0  ;;  %v4044_v31 = vpop.f32.mrb[0].mxu1 }
 0x1c6   :  { %v3324_v32 = vadd.f32 %v1428_v30, %v270_v27  ;;  %v1430_v33 = vpop.f32.mrb[1].mxu0  ;;  %v1594_v34 = vpop.f32.mrb[1].mxu1  ;;  %v3824_v27 = vld [vmem:[#allocation4 + $0x34c] ss:$16 sps:$4 sm:$0xff]   ;;  %v3827_v30 = vld [vmem:[#allocation4 + $0x364] ss:$16 sps:$4 sm:$0xff]  }
 0x1c7   :  { %v3325_v35 = vadd.f32 %v1430_v33, %v274_v28  ;;  %v3327_v36 = vadd.f32 %v1594_v34, %v282_v29  ;;  %v1432_v37 = vpop.f32.mrb[2].mxu0  ;;  %v1596_v38 = vpop.f32.mrb[2].mxu1  ;;  %v3819_v28 = vld [vmem:[#allocation4 + $0x340] ss:$16 sps:$4 sm:$0xff]   ;;  %v3822_v29 = vld [vmem:[#allocation4 + $0x348] ss:$16 sps:$4 sm:$0xff]  }
 0x1c8   :  { %v1599_v39 = vmax.f32 %v3324_v32, 0.0  ;;  %v1433_v40 = vpop.f32.mrb[3].mxu0  ;;  %v1597_v41 = vpop.f32.mrb[3].mxu1  ;;  %v3830_v32 = vld [vmem:[#allocation4 + $0x36c] ss:$16 sps:$4 sm:$0xff]  }
 0x1c9   :  { %v1600_v42 = vmax.f32 %v3325_v35, 0.0  ;;  %v1602_v43 = vmax.f32 %v3327_v36, 0.0  ;;  %v3825_v33 = vld [vmem:[#allocation4 + $0x360] ss:$16 sps:$4 sm:$0xff]   ;;  %v3828_v34 = vld [vmem:[#allocation4 + $0x368] ss:$16 sps:$4 sm:$0xff]  }
 0x1ca   :  { %v1603_v47 = vpack.c.bf16 %v1599_v39, %v1599_v39  ;;  %v3833_v35 = vld [vmem:[#allocation4 + $0x384] ss:$16 sps:$4 sm:$0xff]   ;;  %v3836_v36 = vld [vmem:[#allocation4 + $0x38c] ss:$16 sps:$4 sm:$0xff]   ;;  %v3831_v37 = vld [vmem:[#allocation4 + $0x380] ss:$16 sps:$4 sm:$0xff]  }
 0x1cb   :  { %v1604_v44 = vpack.c.bf16 %v1600_v42, %v1600_v42  ;;  %v1606_v50 = vpack.c.bf16 %v1602_v43, %v1602_v43  ;;  %v3834_v38 = vld [vmem:[#allocation4 + $0x388] ss:$16 sps:$4 sm:$0xff]   ;;  %v277_v39 = vsub.s32 2, %v4025_v22  ;;  %v3839_v40 = vld [vmem:[#allocation4 + $0x3a4] ss:$16 sps:$4 sm:$0xff]  }
 0x1cc   :  { %v3842_v41 = vld [vmem:[#allocation4 + $0x3ac] ss:$16 sps:$4 sm:$0xff]   ;;  %v3837_v42 = vld [vmem:[#allocation4 + $0x3a0] ss:$16 sps:$4 sm:$0xff]   ;;  %v3840_v43 = vld [vmem:[#allocation4 + $0x3a8] ss:$16 sps:$4 sm:$0xff]  }
 0x1cd   :  { %2429 = vmatprep.mubr.bf16.mxu0 %v1604_v44  ;;  %2511 = vmatprep.mubr.bf16.mxu1 %v1604_v44  ;;  %v278_v44 = vrot.slane %v4031_v24, %v277_v39  ;;  %v3855_v24 = vld [vmem:[%s4169_s5 + $0x40] sm:$0xff]  }
 0x1ce   :  { %2430 = vmatmul.mubr.bf16.vlgmr.msra.gmra.mrb[4].mxu0 %v1603_v47  ;;  %2512 = vmatmul.mubr.bf16.vlgmr.msra.gmra.mrb[4].mxu1 %v1603_v47  ;;  %v3843_v47 = vld [vmem:[#allocation4 + $0x3c0] ss:$16 sps:$4 sm:$0xff]  }
 0x1cf   :  { %2439 = vmatpush1.bf16.msra.mxu0 %v3759_v45  ;;  %2521 = vmatpush1.bf16.msra.mxu1 %v3762_v46  ;;  %v3845_v45 = vld [vmem:[#allocation4 + $0x3c4] ss:$16 sps:$4 sm:$0xff]   ;;  %v3848_v46 = vld [vmem:[#allocation4 + $0x3cc] ss:$16 sps:$4 sm:$0xff]  }
 0x1d0   :  { %2470 = vmatprep.mubr.bf16.mxu0 %v1606_v50  ;;  %2552 = vmatprep.mubr.bf16.mxu1 %v1606_v50  ;;  %v3851_v50 = vld [vmem:[#allocation4 + $0x3e4] ss:$16 sps:$4 sm:$0xff]  }
 0x1d1   :  { %2440 = vmatprep.subr.bf16.mxu0 %v3767_v48  ;;  %2522 = vmatprep.subr.bf16.mxu1 %v3770_v49  ;;  %v3846_v48 = vld [vmem:[#allocation4 + $0x3c8] ss:$16 sps:$4 sm:$0xff]   ;;  %v3326_v49 = vadd.f32 %v4044_v31, %v278_v44  ;;  %v3857_v31 = vld [vmem:[%s4169_s5] sm:$0xff]  }
 0x1d3   :  { %2441 = vmatpush1.bf16.msra.mxu0 %v3765_v51  ;;  %2523 = vmatpush1.bf16.msra.mxu1 %v3768_v52  ;;  %v3854_v51 = vld [vmem:[#allocation4 + $0x3ec] ss:$16 sps:$4 sm:$0xff]   ;;  %v3849_v52 = vld [vmem:[#allocation4 + $0x3e0] ss:$16 sps:$4 sm:$0xff]  }
 0x1d4   :  { %2442 = vmatprep.subr.bf16.mxu0 %v3773_v53  ;;  %2524 = vmatprep.subr.bf16.mxu1 %v3776_v54  ;;  %v3852_v53 = vld [vmem:[#allocation4 + $0x3e8] ss:$16 sps:$4 sm:$0xff]   ;;  %v1601_v54 = vmax.f32 %v3326_v49, 0.0 }
 0x1d7   :  { %2443 = vmatpush1.bf16.msra.mxu0 %v3771_v55  ;;  %2525 = vmatpush1.bf16.msra.mxu1 %v3774_v56  ;;  %v3856_v55 = vld [vmem:[%s4169_s5 + $0xc0] sm:$0xff]  }
 0x1d8   :  { %2444 = vmatprep.subr.bf16.mxu0 %v3779_v57  ;;  %2526 = vmatprep.subr.bf16.mxu1 %v3782_v58  ;;  %v3858_v56 = vld [vmem:[%s4169_s5 + $0x80] sm:$0xff]   ;;  %v1605_v57 = vpack.c.bf16 %v1601_v54, %v1601_v54  ;;  %v3859_v58 = vld [vmem:[%s4169_s5 + $0x48] sm:$0xff]  }
 0x1db   :  { %2445 = vmatpush1.bf16.msra.mxu0 %v3777_v59  ;;  %2527 = vmatpush1.bf16.msra.mxu1 %v3780_v60  ;;  %v3860_v59 = vld [vmem:[%s4169_s5 + $0xc8] sm:$0xff]  }
 0x1dc   :  { %2446 = vmatprep.subr.bf16.mxu0 %v3785_v61  ;;  %2528 = vmatprep.subr.bf16.mxu1 %v3788_v62  ;;  %v3861_v60 = vld [vmem:[%s4169_s5 + $0x8] sm:$0xff]   ;;  %v3863_v62 = vld [vmem:[%s4169_s5 + $0x50] sm:$0xff]  }
 0x1dd   :  { %v3862_v61 = vld [vmem:[%s4169_s5 + $0x88] sm:$0xff]  }
 0x1df   :  { %2447 = vmatpush1.bf16.msra.mxu0 %v3783_v63  ;;  %2529 = vmatpush1.bf16.msra.mxu1 %v3786_v0  ;;  %v3864_v63 = vld [vmem:[%s4169_s5 + $0xd0] sm:$0xff]  }
 0x1e0   :  { %2448 = vmatprep.subr.bf16.mxu0 %v3791_v1  ;;  %2530 = vmatprep.subr.bf16.mxu1 %v3794_v2  ;;  %v3865_v0 = vld [vmem:[%s4169_s5 + $0x10] sm:$0xff]   ;;  %v3867_v2 = vld [vmem:[%s4169_s5 + $0x58] sm:$0xff]  }
 0x1e1   :  { %v3866_v1 = vld [vmem:[%s4169_s5 + $0x90] sm:$0xff]  }
 0x1e3   :  { %2449 = vmatpush1.bf16.msra.mxu0 %v3789_v3  ;;  %2531 = vmatpush1.bf16.msra.mxu1 %v3792_v4  ;;  %v3868_v3 = vld [vmem:[%s4169_s5 + $0xd8] sm:$0xff]  }
 0x1e4   :  { %2450 = vmatprep.subr.bf16.mxu0 %v3797_v5  ;;  %2532 = vmatprep.subr.bf16.mxu1 %v3800_v6  ;;  %v3869_v4 = vld [vmem:[%s4169_s5 + $0x18] sm:$0xff]   ;;  %v3871_v6 = vld [vmem:[%s4169_s5 + $0x60] sm:$0xff]  }
 0x1e5   :  { %v3870_v5 = vld [vmem:[%s4169_s5 + $0x98] sm:$0xff]  }
 0x1e7   :  { %2451 = vmatpush1.bf16.msra.mxu0 %v3795_v7  ;;  %2533 = vmatpush1.bf16.msra.mxu1 %v3798_v8  ;;  %v3872_v7 = vld [vmem:[%s4169_s5 + $0xe0] sm:$0xff]  }
 0x1e8   :  { %2452 = vmatprep.subr.bf16.mxu0 %v3803_v9  ;;  %2534 = vmatprep.subr.bf16.mxu1 %v3806_v10  ;;  %v3873_v8 = vld [vmem:[%s4169_s5 + $0x20] sm:$0xff]   ;;  %v3875_v10 = vld [vmem:[%s4169_s5 + $0x68] sm:$0xff]  }
 0x1e9   :  { %v3874_v9 = vld [vmem:[%s4169_s5 + $0xa0] sm:$0xff]  }
 0x1eb   :  { %2453 = vmatpush1.bf16.msra.mxu0 %v3801_v11  ;;  %2535 = vmatpush1.bf16.msra.mxu1 %v3804_v12  ;;  %v3876_v11 = vld [vmem:[%s4169_s5 + $0xe8] sm:$0xff]  }
 0x1ec   :  { %2454 = vmatprep.subr.bf16.mxu0 %v3809_v13  ;;  %2536 = vmatprep.subr.bf16.mxu1 %v3812_v14  ;;  %v3877_v12 = vld [vmem:[%s4169_s5 + $0x28] sm:$0xff]   ;;  %v3879_v14 = vld [vmem:[%s4169_s5 + $0x70] sm:$0xff]  }
 0x1ed   :  { %v3878_v13 = vld [vmem:[%s4169_s5 + $0xa8] sm:$0xff]  }
 0x1ef   :  { %2455 = vmatpush1.bf16.msra.mxu0 %v3807_v15  ;;  %2537 = vmatpush1.bf16.msra.mxu1 %v3810_v16  ;;  %v3880_v15 = vld [vmem:[%s4169_s5 + $0xf0] sm:$0xff]  }
 0x1f0   :  { %2456 = vmatprep.subr.bf16.mxu0 %v3815_v17  ;;  %2538 = vmatprep.subr.bf16.mxu1 %v3818_v18  ;;  %v3881_v16 = vld [vmem:[%s4169_s5 + $0x30] sm:$0xff]   ;;  %v3883_v18 = vld [vmem:[%s4169_s5 + $0x78] sm:$0xff]  }
 0x1f1   :  { %v3882_v17 = vld [vmem:[%s4169_s5 + $0xb0] sm:$0xff]  }
 0x1f3   :  { %2457 = vmatpush1.bf16.msra.mxu0 %v3813_v19  ;;  %2539 = vmatpush1.bf16.msra.mxu1 %v3816_v20  ;;  %v3884_v19 = vld [vmem:[%s4169_s5 + $0xf8] sm:$0xff]  }
 0x1f4   :  { %2458 = vmatprep.subr.bf16.mxu0 %v3821_v21  ;;  %2540 = vmatprep.subr.bf16.mxu1 %v3824_v27  ;;  %v3885_v20 = vld [vmem:[%s4169_s5 + $0x38] sm:$0xff]   ;;  %v1735_v27 = vld [vmem:[%s4168_s4] sm:$0xf] }
 0x1f5   :  { %v3886_v21 = vld [vmem:[%s4169_s5 + $0xb8] sm:$0xff]  }
 0x1f7   :  { %2459 = vmatpush1.bf16.msra.mxu0 %v3819_v28  ;;  %2541 = vmatpush1.bf16.msra.mxu1 %v3822_v29  ;;  %v1740_v28 = vrot.slane %v1735_v27, %v269_v23  ;;  %v1748_v29 = vrot.slane %v1735_v27, %v277_v39 }
 0x1f8   :  { %2460 = vmatprep.subr.bf16.mxu0 %v3827_v30  ;;  %2542 = vmatprep.subr.bf16.mxu1 %v3830_v32  ;;  %v1744_v30 = vrot.slane %v1735_v27, %v273_v25  ;;  %v1752_v32 = vrot.slane %v1735_v27, %v281_v26 }
 0x1fb   :  { %2461 = vmatpush1.bf16.msra.mxu0 %v3825_v33  ;;  %2543 = vmatpush1.bf16.msra.mxu1 %v3828_v34 }
 0x1fc   :  { %2462 = vmatprep.subr.bf16.mxu0 %v3833_v35  ;;  %2544 = vmatprep.subr.bf16.mxu1 %v3836_v36 }
 0x1ff   :  { %2463 = vmatpush1.bf16.msra.mxu0 %v3831_v37  ;;  %2545 = vmatpush1.bf16.msra.mxu1 %v3834_v38 }
 0x200   :  { %2464 = vmatprep.subr.bf16.mxu0 %v3839_v40  ;;  %2546 = vmatprep.subr.bf16.mxu1 %v3842_v41 }
 0x203   :  { %2465 = vmatpush1.bf16.msra.mxu0 %v3837_v42  ;;  %2547 = vmatpush1.bf16.msra.mxu1 %v3840_v43 }
 0x204   :  { %2466 = vmatprep.subr.bf16.mxu0 %v3845_v45  ;;  %2548 = vmatprep.subr.bf16.mxu1 %v3848_v46 }
 0x207   :  { %2467 = vmatpush1.bf16.msra.mxu0 %v3843_v47  ;;  %2549 = vmatpush1.bf16.msra.mxu1 %v3846_v48 }
 0x208   :  { %2468 = vmatprep.subr.bf16.mxu0 %v3851_v50  ;;  %2550 = vmatprep.subr.bf16.mxu1 %v3854_v51  ;;  %v3247_v51 = vld [vmem:[%s4170_s6] ss:$0 sm:$0xff] }
 0x20b   :  { %2469 = vmatpush1.bf16.msra.mxu0 %v3849_v52  ;;  %2551 = vmatpush1.bf16.msra.mxu1 %v3852_v53 }
 0x20c   :  { %3280 = vmatprep.subr.bf16.mxu0 %v3855_v24  ;;  %3302 = vmatprep.subr.bf16.mxu1 %v3856_v55 }
 0x20e   :  { %2471 = vmatmul.mubr.bf16.vlgmr.msra.gmra.mrb[4].mxu0 %v1605_v57  ;;  %2553 = vmatmul.mubr.bf16.vlgmr.msra.gmra.mrb[4].mxu1 %v1605_v57 }
 0x20f   :  { %3281 = vmatpush3.bf16.msra.mxu0 %v3857_v31  ;;  %3303 = vmatpush3.bf16.msra.mxu1 %v3858_v56 }
 0x210   :  { %3282 = vmatprep.subr.bf16.mxu0 %v3859_v58  ;;  %3304 = vmatprep.subr.bf16.mxu1 %v3860_v59 }
 0x213   :  { %3283 = vmatpush3.bf16.msra.mxu0 %v3861_v60  ;;  %3305 = vmatpush3.bf16.msra.mxu1 %v3862_v61 }
 0x214   :  { %3284 = vmatprep.subr.bf16.mxu0 %v3863_v62  ;;  %3306 = vmatprep.subr.bf16.mxu1 %v3864_v63 }
 0x217   :  { %3285 = vmatpush3.bf16.msra.mxu0 %v3865_v0  ;;  %3307 = vmatpush3.bf16.msra.mxu1 %v3866_v1 }
 0x218   :  { %3286 = vmatprep.subr.bf16.mxu0 %v3867_v2  ;;  %3308 = vmatprep.subr.bf16.mxu1 %v3868_v3 }
 0x21b   :  { %3287 = vmatpush3.bf16.msra.mxu0 %v3869_v4  ;;  %3309 = vmatpush3.bf16.msra.mxu1 %v3870_v5 }
 0x21c   :  { %3288 = vmatprep.subr.bf16.mxu0 %v3871_v6  ;;  %3310 = vmatprep.subr.bf16.mxu1 %v3872_v7 }
 0x21f   :  { %3289 = vmatpush3.bf16.msra.mxu0 %v3873_v8  ;;  %3311 = vmatpush3.bf16.msra.mxu1 %v3874_v9 }
 0x220   :  { %3290 = vmatprep.subr.bf16.mxu0 %v3875_v10  ;;  %3312 = vmatprep.subr.bf16.mxu1 %v3876_v11 }
 0x223   :  { %3291 = vmatpush3.bf16.msra.mxu0 %v3877_v12  ;;  %3313 = vmatpush3.bf16.msra.mxu1 %v3878_v13 }
 0x224   :  { %3292 = vmatprep.subr.bf16.mxu0 %v3879_v14  ;;  %3314 = vmatprep.subr.bf16.mxu1 %v3880_v15 }
 0x227   :  { %3293 = vmatpush3.bf16.msra.mxu0 %v3881_v16  ;;  %3315 = vmatpush3.bf16.msra.mxu1 %v3882_v17 }
 0x228   :  { %3294 = vmatprep.subr.bf16.mxu0 %v3883_v18  ;;  %3316 = vmatprep.subr.bf16.mxu1 %v3884_v19 }
 0x22b   :  { %3295 = vmatpush3.bf16.msra.mxu0 %v3885_v20  ;;  %3317 = vmatpush3.bf16.msra.mxu1 %v3886_v21 }
 0x2e1   :  { %v2472_v33 = vpop.f32.mrb[4].mxu0  ;;  %v2554_v34 = vpop.f32.mrb[4].mxu1 }
 0x2e2   :  { %v3328_v35 = vadd.f32 %v2472_v33, %v1740_v28  ;;  %v3330_v36 = vadd.f32 %v2554_v34, %v1748_v29  ;;  %v2474_v37 = vpop.f32.mrb[5].mxu0  ;;  %v2556_v38 = vpop.f32.mrb[5].mxu1 }
 0x2e3   :  { %v3329_v40 = vadd.f32 %v2474_v37, %v1744_v30  ;;  %v3331_v41 = vadd.f32 %v2556_v38, %v1752_v32  ;;  %v2476_v42 = vpop.f32.mrb[6].mxu0  ;;  %v2558_v43 = vpop.f32.mrb[6].mxu1 }
 0x2e4   :  { %v2561_v23 = vmax.f32 %v3328_v35, 0.0  ;;  %v2563_v44 = vmax.f32 %v3330_v36, 0.0  ;;  %v2477_v45 = vpop.f32.mrb[7].mxu0  ;;  %v2559_v39 = vpop.f32.mrb[7].mxu1 }
 0x2e5   :  { %v2562_v46 = vmax.f32 %v3329_v40, 0.0  ;;  %v2564_v47 = vmax.f32 %v3331_v41, 0.0 }
 0x2e6   :  { %v2565_v22 = vpack.c.bf16 %v2561_v23, %v2561_v23  ;;  %v2567_v26 = vpack.c.bf16 %v2563_v44, %v2563_v44 }
 0x2e7   :  { %v2566_v25 = vpack.c.bf16 %v2562_v46, %v2562_v46  ;;  %v2568_v48 = vpack.c.bf16 %v2564_v47, %v2564_v47 }
 0x2e9   :  { %2864 = vmatprep.mubr.bf16.mxu0 %v2566_v25  ;;  %2904 = vmatprep.mubr.bf16.mxu1 %v2568_v48 }
 0x2ea   :  { %2865 = vmatmul.mubr.bf16.vlgmr.msra.gmra.mrb[8].mxu0 %v2565_v22  ;;  %2905 = vmatmul.mubr.bf16.vlgmr.msra.gmra.mrb[8].mxu1 %v2567_v26 }
 0x3bd   :  { %v3296_v49 = vpop.f32.mrb[8].mxu0  ;;  %v3318_v50 = vpop.f32.mrb[8].mxu1 }
 0x3be   :  { %v3297_v52 = vpop.f32.mrb[9].mxu0  ;;  %v3319_v53 = vpop.f32.mrb[9].mxu1 }
 0x3bf   :  { %v3298_v54 = vadd.f32 %v3297_v52, %v3296_v49  ;;  %v3320_v24 = vadd.f32 %v3319_v53, %v3318_v50  ;;  %v3299_v55 = vpop.f32.mrb[10].mxu0  ;;  %v3321_v31 = vpop.f32.mrb[10].mxu1 }
 0x3c0   :  { %v3300_v56 = vpop.f32.mrb[11].mxu0  ;;  %v3322_v57 = vpop.f32.mrb[11].mxu1 }
 0x3c1   :  { %v2867_v58 = vadd.f32 %v3298_v54, %v3247_v51 }
 0x3c3   :  { %v2907_v59 = vadd.f32 %v3320_v24, %v2867_v58 }
 0x3c5   :  { %v2912_v60 = vmax.f32 %v2907_v59, 0.0 }
 0x3c7   :  { %v2913_v61 = vpack.c.bf16 %v2912_v60, %v2912_v60 }
 0x3c9   :  { %2914 = vst [vmem:[%s4171_s7] sm:$0xf] %v2913_v61 }
 0x3ca   :  { %2919 = vsyncpa [#allocation3], 1 }
 0x3cb   :  { %2920 = vsyncpa [#allocation5], 1 }

</bundles_post_ra>
